<compile_context>
chip_gen: v7x
topology: tpu7x:2x2x1
jax: 0.10.0
libtpu: 0.0.40
codegen_flags: <defaults>
</compile_context>

<pallas_src>
import jax
import jax.numpy as jnp
from jax.experimental import pallas as pl
from jax.experimental.pallas import tpu as pltpu


HIDDEN = 64
_TB_MAX = 8192            # max batch rows per grid step (~10 MiB VMEM at this size)
_SMALL_BATCH = 256        # below this, a fused XLA dot chain beats kernel launch cost
_SPLIT_BATCH = 2048       # above this, force >=2 grid steps (v7x megacore sharding)
_VMEM_LIMIT = 48 << 20    # > v5e's 16 MiB / default 32 MiB scoped, < v7x 64 MiB physical


def _round_up(x, m):
    return ((x + m - 1) // m) * m


def _mlp_kernel(x_ref, w1_ref, b1_ref, w2_ref, b2_ref, w3_ref, b3_ref, o_ref):
    # obs arrives f32; cast to bf16 in-kernel (no separate wrapper cast op / HBM trip).
    x = x_ref[...].astype(jnp.bfloat16)  # (TB, in_dim)

    # layer1: bf16 MXU matmul, f32 accumulate + bias + ReLU
    h1 = jnp.dot(x, w1_ref[...], preferred_element_type=jnp.float32) + b1_ref[...]
    h1 = jnp.maximum(h1, 0.0).astype(jnp.bfloat16)

    # layer2
    h2 = jnp.dot(h1, w2_ref[...], preferred_element_type=jnp.float32) + b2_ref[...]
    h2 = jnp.maximum(h2, 0.0).astype(jnp.bfloat16)

    # layer3 (no activation)
    out = jnp.dot(h2, w3_ref[...], preferred_element_type=jnp.float32) + b3_ref[...]
    o_ref[...] = out.astype(o_ref.dtype)


def prepare_params(params):
    """One-time cast of parameters to kernel dtypes (call once, reuse every step).

    Weights (in_features, out_features) -> bf16 for the MXU; biases -> (1, F) f32
    so they broadcast over the batch (sublane) axis inside the kernel.
    """
    return {
        "w1": params["w1"].astype(jnp.bfloat16),
        "w2": params["w2"].astype(jnp.bfloat16),
        "w3": params["w3"].astype(jnp.bfloat16),
        "b1": params["b1"].reshape(1, -1).astype(jnp.float32),
        "b2": params["b2"].reshape(1, -1).astype(jnp.float32),
        "b3": params["b3"].reshape(1, -1).astype(jnp.float32),
    }


def _jnp_forward(obs, p):
    """Small-batch / single-obs fallback; same numerics as the kernel
    (bf16 matmul operands, f32 accumulate, f32 bias/ReLU)."""
    x = obs.astype(jnp.bfloat16)
    h1 = jnp.maximum(
        jnp.dot(x, p["w1"], preferred_element_type=jnp.float32) + p["b1"], 0.0)
    h2 = jnp.maximum(
        jnp.dot(h1.astype(jnp.bfloat16), p["w2"], preferred_element_type=jnp.float32)
        + p["b2"], 0.0)
    return (jnp.dot(h2.astype(jnp.bfloat16), p["w3"], preferred_element_type=jnp.float32)
            + p["b3"])


def _pick_tile(batch, tile_batch):
    """Choose a legal batch tile: either the full batch (always a legal block),
    or a multiple of 8 (sublane divisibility for (8,128) tiling)."""
    if tile_batch is not None:
        tb = int(tile_batch)
        if tb >= batch:
            return batch
        return min(_round_up(tb, 8), _round_up(batch, 8))
    if batch <= _SPLIT_BATCH:
        return batch                                   # single block == full dim (legal)
    # Large batch: at least 2 grid steps (v7x has 2 TCs to shard the parallel axis),
    # capped so per-tile VMEM stays ~10 MiB (fits v5e scoped / v7x physical budgets).
    return min(_TB_MAX, _round_up(pl.cdiv(batch, 2), 8))


def feedforward_nn_forward(obs, prepared, *, tile_batch=None, use_pallas=None):
    """Forward pass matching FeedForwardNN.forward.

    obs: (batch, in_dim) or (in_dim,) float array.
    prepared: output of prepare_params().
    tile_batch: optional override of the batch tile size (rows per grid step).
    use_pallas: force (True) / forbid (False) the Pallas path; None = auto.
    """
    squeeze = False
    if obs.ndim == 1:  # 'testing' mode: flat single observation
        obs = obs[None, :]
        squeeze = True

    batch, in_dim = obs.shape
    out_dim = prepared["w3"].shape[1]

    if use_pallas is None:
        use_pallas = (not squeeze) and batch >= _SMALL_BATCH

    if not use_pallas:
        out = _jnp_forward(obs, prepared)
        return out[0] if squeeze else out

    tb = _pick_tile(batch, tile_batch)
    grid = (pl.cdiv(batch, tb),)

    const2 = lambda i: (0, 0)  # weights/biases: one resident VMEM copy for all steps

    param_bytes = sum(int(v.size) * v.dtype.itemsize for v in prepared.values())
    cost = pl.CostEstimate(
        flops=2 * batch * (in_dim * HIDDEN + HIDDEN * HIDDEN + HIDDEN * out_dim),
        transcendentals=0,
        bytes_accessed=int(obs.size) * 4 + batch * out_dim * 4 + param_bytes,
    )

    out = pl.pallas_call(
        _mlp_kernel,
        out_shape=jax.ShapeDtypeStruct((batch, out_dim), jnp.float32),
        grid=grid,
        in_specs=[
            pl.BlockSpec((tb, in_dim), lambda i: (i, 0)),      # obs: streamed per tile
            pl.BlockSpec((in_dim, HIDDEN), const2),            # w1
            pl.BlockSpec((1, HIDDEN), const2),                 # b1
            pl.BlockSpec((HIDDEN, HIDDEN), const2),            # w2
            pl.BlockSpec((1, HIDDEN), const2),                 # b2
            pl.BlockSpec((HIDDEN, out_dim), const2),           # w3
            pl.BlockSpec((1, out_dim), const2),                # b3
        ],
        out_specs=pl.BlockSpec((tb, out_dim), lambda i: (i, 0)),
        compiler_params=pltpu.CompilerParams(
            dimension_semantics=("parallel",),
            vmem_limit_bytes=_VMEM_LIMIT,
        ),
        cost_estimate=cost,
    )(
        obs,  # f32 — cast to bf16 inside the kernel
        prepared["w1"], prepared["b1"],
        prepared["w2"], prepared["b2"],
        prepared["w3"], prepared["b3"],
    )

    if squeeze:
        out = out[0]
    return out


def init_params(key, in_dim, out_dim):
    """Deterministic init mimicking nn.Linear default (uniform(-1/sqrt(fan_in), +))."""
    ks = jax.random.split(key, 6)

    def linear_init(kw, kb, fan_in, fan_out):
        bound = 1.0 / jnp.sqrt(jnp.float32(fan_in))
        w = jax.random.uniform(kw, (fan_in, fan_out), jnp.float32, -bound, bound)
        b = jax.random.uniform(kb, (fan_out,), jnp.float32, -bound, bound)
        return w, b

    w1, b1 = linear_init(ks[0], ks[1], in_dim, HIDDEN)
    w2, b2 = linear_init(ks[2], ks[3], HIDDEN, HIDDEN)
    w3, b3 = linear_init(ks[4], ks[5], HIDDEN, out_dim)
    return {"w1": w1, "b1": b1, "w2": w2, "b2": b2, "w3": w3, "b3": b3}


def _reference(obs, p):
    # Reference replicates the kernel's numerics: bf16 matmul operands, f32 accumulate,
    # f32 bias/ReLU — so comparison tolerances can stay tight.
    bf = lambda a: a.astype(jnp.bfloat16)
    h1 = jnp.maximum(
        jnp.dot(bf(obs), bf(p["w1"]), preferred_element_type=jnp.float32) + p["b1"], 0.0)
    h2 = jnp.maximum(
        jnp.dot(bf(h1), bf(p["w2"]), preferred_element_type=jnp.float32) + p["b2"], 0.0)
    return jnp.dot(bf(h2), bf(p["w3"]), preferred_element_type=jnp.float32) + p["b3"]


if __name__ == "__main__":
    key = jax.random.PRNGKey(0)
    k_obs, k_obs2, k_obs3, k_params = jax.random.split(key, 4)

    in_dim, out_dim = 16, 4
    params = init_params(k_params, in_dim, out_dim)
    prepared = prepare_params(params)  # cast once, not per call

    # --- Batched 'training' mode, large enough to take the Pallas path -----------
    batch = 512
    obs = jax.random.normal(k_obs, (batch, in_dim), dtype=jnp.float32)
    out = jax.block_until_ready(feedforward_nn_forward(obs, prepared))
    ref = _reference(obs, params)
    assert out.shape == (batch, out_dim), out.shape
    assert jnp.allclose(out, ref, atol=2e-3, rtol=2e-3), "pallas path mismatch"

    # --- Small batch: jnp fallback (launch cost >> math at these sizes) ----------
    small = obs[:8]
    out_small = jax.block_until_ready(feedforward_nn_forward(small, prepared))
    assert out_small.shape == (8, out_dim)
    assert jnp.allclose(out_small, ref[:8], atol=2e-3, rtol=2e-3)

    # --- Flat-observation 'testing' mode ------------------------------------------
    flat_out = jax.block_until_ready(feedforward_nn_forward(obs[0], prepared))
    assert flat_out.shape == (out_dim,)
    assert jnp.allclose(flat_out, ref[0], atol=2e-3, rtol=2e-3)

    # --- Ragged batch through the Pallas kernel: explicit tile, masked last block --
    obs_ragged = jax.random.normal(k_obs2, (300, in_dim), dtype=jnp.float32)
    out_ragged = jax.block_until_ready(
        feedforward_nn_forward(obs_ragged, prepared, tile_batch=128, use_pallas=True))
    ref_ragged = _reference(obs_ragged, params)
    assert out_ragged.shape == (300, out_dim)
    assert jnp.allclose(out_ragged, ref_ragged, atol=2e-3, rtol=2e-3)

    # --- Non-multiple-of-8 user tile: wrapper rounds it up to a legal block -------
    obs_odd = jax.random.normal(k_obs3, (40, in_dim), dtype=jnp.float32)
    out_odd = jax.block_until_ready(
        feedforward_nn_forward(obs_odd, prepared, tile_batch=10, use_pallas=True))
    ref_odd = _reference(obs_odd, params)
    assert out_odd.shape == (40, out_dim)
    assert jnp.allclose(out_odd, ref_odd, atol=2e-3, rtol=2e-3)

    print("KERNEL_OK")
</pallas_src>

<mosaic_0001>
module attributes {stable_mosaic.version = 11 : i64} {
  func.func @_mlp_kernel(%arg0: i32, %arg1: memref<512x16xf32, #tpu.memory_space<vmem>>, %arg2: memref<16x64xbf16, #tpu.memory_space<vmem>>, %arg3: memref<1x64xf32, #tpu.memory_space<vmem>>, %arg4: memref<64x64xbf16, #tpu.memory_space<vmem>>, %arg5: memref<1x64xf32, #tpu.memory_space<vmem>>, %arg6: memref<64x4xbf16, #tpu.memory_space<vmem>>, %arg7: memref<1x4xf32, #tpu.memory_space<vmem>>, %arg8: memref<512x4xf32, #tpu.memory_space<vmem>>) attributes {dimension_semantics = [#tpu.dimension_semantics<parallel>], iteration_bounds = array<i64: 1>, scalar_prefetch = 0 : i64, scratch_operands = 0 : i64, tpu.core_type = #tpu.core_type<tc>, window_params = [{transform_indices = @transform_0, window_bounds = array<i64: 512, 16>}, {pipeline_mode = #tpu.pipeline_mode<synchronous>, transform_indices = @transform_1, window_bounds = array<i64: 16, 64>}, {pipeline_mode = #tpu.pipeline_mode<synchronous>, transform_indices = @transform_2, window_bounds = array<i64: 1, 64>}, {pipeline_mode = #tpu.pipeline_mode<synchronous>, transform_indices = @transform_3, window_bounds = array<i64: 64, 64>}, {pipeline_mode = #tpu.pipeline_mode<synchronous>, transform_indices = @transform_4, window_bounds = array<i64: 1, 64>}, {pipeline_mode = #tpu.pipeline_mode<synchronous>, transform_indices = @transform_5, window_bounds = array<i64: 64, 4>}, {pipeline_mode = #tpu.pipeline_mode<synchronous>, transform_indices = @transform_6, window_bounds = array<i64: 1, 4>}, {transform_indices = @transform_7, window_bounds = array<i64: 512, 4>}]} {
    %c0 = arith.constant 0 : index
    %c0_0 = arith.constant 0 : index
    %0 = vector.load %arg1[%c0, %c0_0] : memref<512x16xf32, #tpu.memory_space<vmem>>, vector<512x16xf32>
    %1 = arith.truncf %0 : vector<512x16xf32> to vector<512x16xbf16>
    %c0_1 = arith.constant 0 : index
    %c0_2 = arith.constant 0 : index
    %2 = vector.load %arg2[%c0_1, %c0_2] : memref<16x64xbf16, #tpu.memory_space<vmem>>, vector<16x64xbf16>
    %cst = arith.constant dense<0.000000e+00> : vector<512x64xf32>
    %3 = tpu.matmul %1, %2, %cst {dimension_numbers = #tpu.dot_dimension_numbers<[1], [0], [0], [1], [0, 0, 1, 1], [], []>} : vector<512x16xbf16>, vector<16x64xbf16>, vector<512x64xf32> -> vector<512x64xf32>
    %c0_3 = arith.constant 0 : index
    %c0_4 = arith.constant 0 : index
    %4 = vector.load %arg3[%c0_3, %c0_4] : memref<1x64xf32, #tpu.memory_space<vmem>>, vector<1x64xf32>
    %5 = vector.broadcast %4 : vector<1x64xf32> to vector<512x64xf32>
    %6 = arith.addf %3, %5 : vector<512x64xf32>
    %cst_5 = arith.constant 0.000000e+00 : f32
    %7 = vector.broadcast %cst_5 : f32 to vector<512x64xf32>
    %8 = arith.maximumf %6, %7 : vector<512x64xf32>
    %9 = arith.truncf %8 : vector<512x64xf32> to vector<512x64xbf16>
    %c0_6 = arith.constant 0 : index
    %c0_7 = arith.constant 0 : index
    %10 = vector.load %arg4[%c0_6, %c0_7] : memref<64x64xbf16, #tpu.memory_space<vmem>>, vector<64x64xbf16>
    %cst_8 = arith.constant dense<0.000000e+00> : vector<512x64xf32>
    %11 = tpu.matmul %9, %10, %cst_8 {dimension_numbers = #tpu.dot_dimension_numbers<[1], [0], [0], [1], [0, 0, 1, 1], [], []>} : vector<512x64xbf16>, vector<64x64xbf16>, vector<512x64xf32> -> vector<512x64xf32>
    %c0_9 = arith.constant 0 : index
    %c0_10 = arith.constant 0 : index
    %12 = vector.load %arg5[%c0_9, %c0_10] : memref<1x64xf32, #tpu.memory_space<vmem>>, vector<1x64xf32>
    %13 = vector.broadcast %12 : vector<1x64xf32> to vector<512x64xf32>
    %14 = arith.addf %11, %13 : vector<512x64xf32>
    %cst_11 = arith.constant 0.000000e+00 : f32
    %15 = vector.broadcast %cst_11 : f32 to vector<512x64xf32>
    %16 = arith.maximumf %14, %15 : vector<512x64xf32>
    %17 = arith.truncf %16 : vector<512x64xf32> to vector<512x64xbf16>
    %c0_12 = arith.constant 0 : index
    %c0_13 = arith.constant 0 : index
    %18 = vector.load %arg6[%c0_12, %c0_13] : memref<64x4xbf16, #tpu.memory_space<vmem>>, vector<64x4xbf16>
    %cst_14 = arith.constant dense<0.000000e+00> : vector<512x4xf32>
    %19 = tpu.matmul %17, %18, %cst_14 {dimension_numbers = #tpu.dot_dimension_numbers<[1], [0], [0], [1], [0, 0, 1, 1], [], []>} : vector<512x64xbf16>, vector<64x4xbf16>, vector<512x4xf32> -> vector<512x4xf32>
    %c0_15 = arith.constant 0 : index
    %c0_16 = arith.constant 0 : index
    %20 = vector.load %arg7[%c0_15, %c0_16] : memref<1x4xf32, #tpu.memory_space<vmem>>, vector<1x4xf32>
    %21 = vector.broadcast %20 : vector<1x4xf32> to vector<512x4xf32>
    %22 = arith.addf %19, %21 : vector<512x4xf32>
    %c0_17 = arith.constant 0 : index
    %c0_18 = arith.constant 0 : index
    %23 = vector.load %arg8[%c0_17, %c0_18] : memref<512x4xf32, #tpu.memory_space<vmem>>, vector<512x4xf32>
    tpu.vector_store %arg8[%c0_17, %c0_18], %22 {strides = array<i32>} : memref<512x4xf32, #tpu.memory_space<vmem>>, vector<512x4xf32>,
    return
  }
  func.func @transform_0(%arg0: i32) -> (i32, i32) {
    %c0_i32 = arith.constant 0 : i32
    %c0_i32_0 = arith.constant 0 : i32
    return %arg0, %c0_i32 : i32, i32
  }
  func.func @transform_1(%arg0: i32) -> (i32, i32) {
    %c0_i32 = arith.constant 0 : i32
    %c0_i32_0 = arith.constant 0 : i32
    %c0_i32_1 = arith.constant 0 : i32
    return %c0_i32, %c0_i32_0 : i32, i32
  }
  func.func @transform_2(%arg0: i32) -> (i32, i32) {
    %c0_i32 = arith.constant 0 : i32
    %c0_i32_0 = arith.constant 0 : i32
    %c0_i32_1 = arith.constant 0 : i32
    return %c0_i32, %c0_i32_0 : i32, i32
  }
  func.func @transform_3(%arg0: i32) -> (i32, i32) {
    %c0_i32 = arith.constant 0 : i32
    %c0_i32_0 = arith.constant 0 : i32
    %c0_i32_1 = arith.constant 0 : i32
    return %c0_i32, %c0_i32_0 : i32, i32
  }
  func.func @transform_4(%arg0: i32) -> (i32, i32) {
    %c0_i32 = arith.constant 0 : i32
    %c0_i32_0 = arith.constant 0 : i32
    %c0_i32_1 = arith.constant 0 : i32
    return %c0_i32, %c0_i32_0 : i32, i32
  }
  func.func @transform_5(%arg0: i32) -> (i32, i32) {
    %c0_i32 = arith.constant 0 : i32
    %c0_i32_0 = arith.constant 0 : i32
    %c0_i32_1 = arith.constant 0 : i32
    return %c0_i32, %c0_i32_0 : i32, i32
  }
  func.func @transform_6(%arg0: i32) -> (i32, i32) {
    %c0_i32 = arith.constant 0 : i32
    %c0_i32_0 = arith.constant 0 : i32
    %c0_i32_1 = arith.constant 0 : i32
    return %c0_i32, %c0_i32_0 : i32, i32
  }
  func.func @transform_7(%arg0: i32) -> (i32, i32) {
    %c0_i32 = arith.constant 0 : i32
    %c0_i32_0 = arith.constant 0 : i32
    return %arg0, %c0_i32 : i32, i32
  }
}

</mosaic_0001>

<bundles_post_ra>
// kernel: tpu_custom_call.1
= control target key start
LH: loop header
LB: loop body
LE: loop exit
PB: predicated region body
PF: predicated region fallthrough
CT: control target
= control target key end

     0   :  { %vm138_vm0 = vcmask 130048   ;;  %vm659_vm1 = vcmask 523264   ;;  %vm1565_vm2 = vcmask 31744   ;;  %s2916_s1 = inlined_call_operand.vmem [shape: bf16[16,64], index: 1, kind: input, shape index: {}]   ;;  %s2917_s0 = inlined_call_operand.vmem [shape: f32[512,16], index: 0, kind: input, shape index: {}]   ;;  %s2918_s3 = inlined_call_operand.vmem [shape: bf16[64,64], index: 3, kind: input, shape index: {}]   ;;  %s2919_s2 = inlined_call_operand.vmem [shape: f32[1,64], index: 2, kind: input, shape index: {}]   ;;  %s2920_s5 = inlined_call_operand.vmem [shape: bf16[64,4], index: 5, kind: input, shape index: {}]   ;;  %s2921_s4 = inlined_call_operand.vmem [shape: f32[1,64], index: 4, kind: input, shape index: {}]   ;;  %s2922_s6 = inlined_call_operand.vmem [shape: f32[1,4], index: 6, kind: input, shape index: {}]   ;;  %s2923_s7 = inlined_call_operand.vmem [shape: f32[512,4], index: 7, kind: output, shape index: {}]  }
   0x1   :  { %v2059_v0 = vld [vmem:[%s2916_s1] sm:$0xff]   ;;  %v28_v2 = vld [vmem:[%s2917_s0 + $0x8] sm:$0xff]  ;;  %v29_v3 = vld [vmem:[%s2917_s0 + $0x10] sm:$0xff] }
   0x2   :  { %v27_v1 = vld [vmem:[%s2917_s0] sm:$0xff]  ;;  %1847 = vmatprep.subr.bf16.mxu0 %v2059_v0  ;;  %v30_v5 = vld [vmem:[%s2917_s0 + $0x18] sm:$0xff]  ;;  %v32_v7 = vld [vmem:[%s2917_s0 + $0x28] sm:$0xff]  ;;  %2057 = vmatprep.subr.bf16.mxu1 %v2059_v0 }
   0x3   :  { %v91_v4 = vpack.c.bf16 %v28_v2, %v27_v1  ;;  %v31_v6 = vld [vmem:[%s2917_s0 + $0x20] sm:$0xff]  ;;  %1848 = vmatpush3.bf16.msra.mxu0 %v2059_v0  ;;  %v92_v8 = vpack.c.bf16 %v30_v5, %v29_v3  ;;  %2058 = vmatpush3.bf16.msra.mxu1 %v2059_v0  ;;  %v33_v10 = vld [vmem:[%s2917_s0 + $0x30] sm:$0xff]  ;;  %v34_v11 = vld [vmem:[%s2917_s0 + $0x38] sm:$0xff] }
   0x4   :  { %v93_v9 = vpack.c.bf16 %v32_v7, %v31_v6  ;;  %v35_v12 = vld [vmem:[%s2917_s0 + $0x40] sm:$0xff]  ;;  %v36_v13 = vld [vmem:[%s2917_s0 + $0x48] sm:$0xff]  ;;  %v94_v14 = vpack.c.bf16 %v34_v11, %v33_v10  ;;  %v61_v18 = vld [vmem:[%s2917_s0 + $0x110] sm:$0xff] }
   0x5   :  { %1849 = vmatprep.mubr.msk.bf16.mxu0 %vm138_vm0, %v91_v4  ;;  %v95_v15 = vpack.c.bf16 %v36_v13, %v35_v12  ;;  %v59_v16 = vld [vmem:[%s2917_s0 + $0x100] sm:$0xff]  ;;  %v60_v17 = vld [vmem:[%s2917_s0 + $0x108] sm:$0xff]  ;;  %v62_v19 = vld [vmem:[%s2917_s0 + $0x118] sm:$0xff] }
   0x6   :  { %1850 = vmatmul.mubr.msk.bf16.vlgmr.msra.gmra.mrb[0].mxu0 %vm138_vm0, %v92_v8  ;;  %v107_v20 = vpack.c.bf16 %v60_v17, %v59_v16  ;;  %v108_v21 = vpack.c.bf16 %v62_v19, %v61_v18  ;;  %v63_v22 = vld [vmem:[%s2917_s0 + $0x120] sm:$0xff]  ;;  %v64_v23 = vld [vmem:[%s2917_s0 + $0x128] sm:$0xff]  ;;  %v37_v25 = vld [vmem:[%s2917_s0 + $0x50] sm:$0xff] }
   0x7   :  { %1853 = vmatprep.mubr.msk.bf16.mxu0 %vm138_vm0, %v93_v9  ;;  %v109_v24 = vpack.c.bf16 %v64_v23, %v63_v22  ;;  %v38_v26 = vld [vmem:[%s2917_s0 + $0x58] sm:$0xff]  ;;  %v39_v27 = vld [vmem:[%s2917_s0 + $0x60] sm:$0xff]  ;;  %v40_v28 = vld [vmem:[%s2917_s0 + $0x68] sm:$0xff] }
   0x8   :  { %1881 = vmatprep.mubr.msk.bf16.mxu1 %vm138_vm0, %v107_v20  ;;  %v65_v29 = vld [vmem:[%s2917_s0 + $0x130] sm:$0xff]  ;;  %v66_v30 = vld [vmem:[%s2917_s0 + $0x138] sm:$0xff]  ;;  %v96_v31 = vpack.c.bf16 %v38_v26, %v37_v25  ;;  %v67_v32 = vld [vmem:[%s2917_s0 + $0x140] sm:$0xff]  ;;  %v97_v34 = vpack.c.bf16 %v40_v28, %v39_v27 }
   0x9   :  { %1882 = vmatmul.mubr.msk.bf16.vlgmr.msra.gmra.mrb[0].mxu1 %vm138_vm0, %v108_v21  ;;  %v68_v33 = vld [vmem:[%s2917_s0 + $0x148] sm:$0xff]  ;;  %v110_v35 = vpack.c.bf16 %v66_v30, %v65_v29  ;;  %v41_v36 = vld [vmem:[%s2917_s0 + $0x70] sm:$0xff]  ;;  %v42_v37 = vld [vmem:[%s2917_s0 + $0x78] sm:$0xff] }
   0xa   :  { %1885 = vmatprep.mubr.msk.bf16.mxu1 %vm138_vm0, %v109_v24  ;;  %v111_v38 = vpack.c.bf16 %v68_v33, %v67_v32  ;;  %v43_v39 = vld [vmem:[%s2917_s0 + $0x80] sm:$0xff]  ;;  %v44_v40 = vld [vmem:[%s2917_s0 + $0x88] sm:$0xff]  ;;  %v69_v41 = vld [vmem:[%s2917_s0 + $0x150] sm:$0xff]  ;;  %v98_v45 = vpack.c.bf16 %v42_v37, %v41_v36 }
   0xb   :  { %v2060_v42 = vld [vmem:[%s2918_s3] sm:$0xff]   ;;  %v2061_v43 = vld [vmem:[%s2918_s3 + $0x8] sm:$0xff]   ;;  %v70_v44 = vld [vmem:[%s2917_s0 + $0x158] sm:$0xff]  ;;  %v99_v48 = vpack.c.bf16 %v44_v40, %v43_v39 }
   0xc   :  { %1913 = vmatprep.subr.bf16.mxu1 %v2060_v42  ;;  %v71_v46 = vld [vmem:[%s2917_s0 + $0x160] sm:$0xff]  ;;  %v72_v47 = vld [vmem:[%s2917_s0 + $0x168] sm:$0xff]  ;;  %v2062_v49 = vld [vmem:[%s2918_s3 + $0x10] sm:$0xff]   ;;  %v112_v50 = vpack.c.bf16 %v70_v44, %v69_v41 }
   0xd   :  { %1914 = vmatpush3.bf16.msra.mxu1 %v2060_v42  ;;  %v113_v51 = vpack.c.bf16 %v72_v47, %v71_v46  ;;  %v45_v52 = vld [vmem:[%s2917_s0 + $0x90] sm:$0xff]  ;;  %v46_v53 = vld [vmem:[%s2917_s0 + $0x98] sm:$0xff]  ;;  %v47_v55 = vld [vmem:[%s2917_s0 + $0xa0] sm:$0xff] }
   0xe   :  { %1854 = vmatmul.mubr.msk.bf16.gmra.mrb[4].mxu0 %vm138_vm0, %v94_v14  ;;  %1915 = vmatprep.subr.bf16.mxu1 %v2061_v43  ;;  %v2063_v54 = vld [vmem:[%s2918_s3 + $0x18] sm:$0xff]   ;;  %v48_v56 = vld [vmem:[%s2917_s0 + $0xa8] sm:$0xff]  ;;  %v73_v57 = vld [vmem:[%s2917_s0 + $0x170] sm:$0xff]  ;;  %v100_v59 = vpack.c.bf16 %v46_v53, %v45_v52 }
   0xf   :  { %1857 = vmatprep.mubr.msk.bf16.mxu0 %vm138_vm0, %v95_v15  ;;  %v74_v58 = vld [vmem:[%s2917_s0 + $0x178] sm:$0xff]  ;;  %v75_v60 = vld [vmem:[%s2917_s0 + $0x180] sm:$0xff]  ;;  %v76_v61 = vld [vmem:[%s2917_s0 + $0x188] sm:$0xff]  ;;  %v101_v62 = vpack.c.bf16 %v48_v56, %v47_v55 }
  0x10   :  { %v114_v63 = vpack.c.bf16 %v74_v58, %v73_v57  ;;  %v115_v0 = vpack.c.bf16 %v76_v61, %v75_v60  ;;  %v49_v1 = vld [vmem:[%s2917_s0 + $0xb0] sm:$0xff]  ;;  %v50_v2 = vld [vmem:[%s2917_s0 + $0xb8] sm:$0xff]  ;;  %v51_v3 = vld [vmem:[%s2917_s0 + $0xc0] sm:$0xff] }
  0x11   :  { %1886 = vmatmul.mubr.msk.bf16.gmra.mrb[4].mxu1 %vm138_vm0, %v110_v35  ;;  %v52_v4 = vld [vmem:[%s2917_s0 + $0xc8] sm:$0xff]  ;;  %v77_v5 = vld [vmem:[%s2917_s0 + $0x190] sm:$0xff]  ;;  %v78_v6 = vld [vmem:[%s2917_s0 + $0x198] sm:$0xff]  ;;  %v102_v7 = vpack.c.bf16 %v50_v2, %v49_v1 }
  0x12   :  { %1889 = vmatprep.mubr.msk.bf16.mxu1 %vm138_vm0, %v111_v38  ;;  %1916 = vmatpush3.bf16.msra.mxu1 %v2061_v43  ;;  %v79_v8 = vld [vmem:[%s2917_s0 + $0x1a0] sm:$0xff]  ;;  %v80_v9 = vld [vmem:[%s2917_s0 + $0x1a8] sm:$0xff]  ;;  %v103_v10 = vpack.c.bf16 %v52_v4, %v51_v3  ;;  %v116_v11 = vpack.c.bf16 %v78_v6, %v77_v5  ;;  %v53_v13 = vld [vmem:[%s2917_s0 + $0xd0] sm:$0xff] }
  0x13   :  { %1917 = vmatprep.subr.bf16.mxu1 %v2062_v49  ;;  %v117_v12 = vpack.c.bf16 %v80_v9, %v79_v8  ;;  %v54_v14 = vld [vmem:[%s2917_s0 + $0xd8] sm:$0xff]  ;;  %v55_v15 = vld [vmem:[%s2917_s0 + $0xe0] sm:$0xff]  ;;  %v56_v16 = vld [vmem:[%s2917_s0 + $0xe8] sm:$0xff] }
  0x14   :  { %v81_v17 = vld [vmem:[%s2917_s0 + $0x1b0] sm:$0xff]  ;;  %v82_v18 = vld [vmem:[%s2917_s0 + $0x1b8] sm:$0xff]  ;;  %v104_v19 = vpack.c.bf16 %v54_v14, %v53_v13  ;;  %v83_v20 = vld [vmem:[%s2917_s0 + $0x1c0] sm:$0xff]  ;;  %v105_v22 = vpack.c.bf16 %v56_v16, %v55_v15 }
  0x15   :  { %v84_v21 = vld [vmem:[%s2917_s0 + $0x1c8] sm:$0xff]  ;;  %v118_v23 = vpack.c.bf16 %v82_v18, %v81_v17  ;;  %v57_v25 = vld [vmem:[%s2917_s0 + $0xf0] sm:$0xff]  ;;  %v58_v26 = vld [vmem:[%s2917_s0 + $0xf8] sm:$0xff] }
  0x16   :  { %1858 = vmatmul.mubr.msk.bf16.gmra.mrb[8].mxu0 %vm138_vm0, %v96_v31  ;;  %1918 = vmatpush3.bf16.msra.mxu1 %v2062_v49  ;;  %v119_v24 = vpack.c.bf16 %v84_v21, %v83_v20  ;;  %v85_v27 = vld [vmem:[%s2917_s0 + $0x1d0] sm:$0xff]  ;;  %v86_v28 = vld [vmem:[%s2917_s0 + $0x1d8] sm:$0xff]  ;;  %v106_v29 = vpack.c.bf16 %v58_v26, %v57_v25  ;;  %v87_v30 = vld [vmem:[%s2917_s0 + $0x1e0] sm:$0xff] }
  0x17   :  { %1861 = vmatprep.mubr.msk.bf16.mxu0 %vm138_vm0, %v97_v34  ;;  %1919 = vmatprep.subr.bf16.mxu1 %v2063_v54  ;;  %v88_v31 = vld [vmem:[%s2917_s0 + $0x1e8] sm:$0xff]  ;;  %v120_v32 = vpack.c.bf16 %v86_v28, %v85_v27  ;;  %v89_v34 = vld [vmem:[%s2917_s0 + $0x1f0] sm:$0xff]  ;;  %v90_v35 = vld [vmem:[%s2917_s0 + $0x1f8] sm:$0xff] }
  0x18   :  { %v121_v33 = vpack.c.bf16 %v88_v31, %v87_v30  ;;  %v122_v36 = vpack.c.bf16 %v90_v35, %v89_v34  ;;  %v2350_v37 = vld [vmem:[%s2919_s2] ss:$0 sm:$0xff]  ;;  %v2065_v49 = vld [vmem:[%s2920_s5 + $0x8] sm:$0xff]   ;;  %v2066_v55 = vld [vmem:[%s2920_s5 + $0x10] sm:$0xff]  }
  0x19   :  { %1890 = vmatmul.mubr.msk.bf16.gmra.mrb[8].mxu1 %vm138_vm0, %v112_v50  ;;  %v2064_v47 = vld [vmem:[%s2920_s5] sm:$0xff]   ;;  %v2067_v4 = vld [vmem:[%s2920_s5 + $0x18] sm:$0xff]  }
  0x1a   :  { %1893 = vmatprep.mubr.msk.bf16.mxu1 %vm138_vm0, %v113_v51  ;;  %1920 = vmatpush3.bf16.msra.mxu1 %v2063_v54 }
  0x1b   :  { %1985 = vmatprep.subr.bf16.mxu0 %v2064_v47 }
  0x1c   :  { %1986 = vmatpush3.bf16.msra.mxu0 %v2064_v47 }
  0x1d   :  { %1987 = vmatprep.subr.bf16.mxu0 %v2065_v49 }
  0x1e   :  { %1862 = vmatmul.mubr.msk.bf16.gmra.mrb[12].mxu0 %vm138_vm0, %v98_v45 }
  0x1f   :  { %1865 = vmatprep.mubr.msk.bf16.mxu0 %vm138_vm0, %v99_v48 }
  0x20   :  { %1988 = vmatpush3.bf16.msra.mxu0 %v2065_v49 }
  0x21   :  { %1894 = vmatmul.mubr.msk.bf16.gmra.mrb[12].mxu1 %vm138_vm0, %v114_v63  ;;  %1989 = vmatprep.subr.bf16.mxu0 %v2066_v55 }
  0x22   :  { %1897 = vmatprep.mubr.msk.bf16.mxu1 %vm138_vm0, %v115_v0 }
  0x24   :  { %1990 = vmatpush3.bf16.msra.mxu0 %v2066_v55 }
  0x25   :  { %1991 = vmatprep.subr.bf16.mxu0 %v2067_v4 }
  0x26   :  { %1866 = vmatmul.mubr.msk.bf16.gmra.mrb[16].mxu0 %vm138_vm0, %v100_v59 }
  0x27   :  { %1869 = vmatprep.mubr.msk.bf16.mxu0 %vm138_vm0, %v101_v62 }
  0x28   :  { %1992 = vmatpush3.bf16.msra.mxu0 %v2067_v4 }
  0x29   :  { %1898 = vmatmul.mubr.msk.bf16.gmra.mrb[16].mxu1 %vm138_vm0, %v116_v11 }
  0x2a   :  { %1901 = vmatprep.mubr.msk.bf16.mxu1 %vm138_vm0, %v117_v12 }
  0x2e   :  { %1870 = vmatmul.mubr.msk.bf16.gmra.mrb[20].mxu0 %vm138_vm0, %v102_v7 }
  0x2f   :  { %1873 = vmatprep.mubr.msk.bf16.mxu0 %vm138_vm0, %v103_v10 }
  0x31   :  { %1902 = vmatmul.mubr.msk.bf16.gmra.mrb[20].mxu1 %vm138_vm0, %v118_v23 }
  0x32   :  { %1905 = vmatprep.mubr.msk.bf16.mxu1 %vm138_vm0, %v119_v24 }
  0x36   :  { %1874 = vmatmul.mubr.msk.bf16.gmra.mrb[24].mxu0 %vm138_vm0, %v104_v19 }
  0x37   :  { %1877 = vmatprep.mubr.msk.bf16.mxu0 %vm138_vm0, %v105_v22 }
  0x39   :  { %1906 = vmatmul.mubr.msk.bf16.gmra.mrb[24].mxu1 %vm138_vm0, %v120_v32 }
  0x3a   :  { %1909 = vmatprep.mubr.msk.bf16.mxu1 %vm138_vm0, %v121_v33 }
  0x3e   :  { %1878 = vmatmul.mubr.msk.bf16.gmra.mrb[28].mxu0 %vm138_vm0, %v106_v29 }
  0x41   :  { %1910 = vmatmul.mubr.msk.bf16.gmra.mrb[28].mxu1 %vm138_vm0, %v122_v36 }
  0xd9   :  { %v1851_v38 = vpop.f32.mrb[0].mxu0 }
  0xda   :  { %v278_v39 = vadd.f32 %v1851_v38, %v2350_v37  ;;  %v269_v40 = vpop.f32.mrb[1].mxu0 }
  0xdb   :  { %v270_v41 = vadd.f32 %v2350_v37, %v269_v40  ;;  %v1852_v42 = vpop.f32.mrb[2].mxu0 }
  0xdc   :  { %v281_v43 = vadd.f32 %v1852_v42, %v2350_v37  ;;  %v272_v44 = vpop.f32.mrb[3].mxu0  ;;  %v526_v45 = vmax.f32 %v278_v39, 0.0  ;;  %v1883_v60 = vpop.f32.mrb[0].mxu1 }
  0xdd   :  { %v273_v46 = vadd.f32 %v2350_v37, %v272_v44  ;;  %v524_v50 = vmax.f32 %v270_v41, 0.0  ;;  %v406_v63 = vadd.f32 %v1883_v60, %v2350_v37  ;;  %v397_v0 = vpop.f32.mrb[1].mxu1 }
  0xde   :  { %v527_v48 = vmax.f32 %v281_v43, 0.0  ;;  %v398_v2 = vadd.f32 %v2350_v37, %v397_v0  ;;  %v1884_v3 = vpop.f32.mrb[2].mxu1 }
  0xdf   :  { %v525_v51 = vmax.f32 %v273_v46, 0.0  ;;  %v558_v7 = vmax.f32 %v406_v63, 0.0  ;;  %v409_v8 = vadd.f32 %v1884_v3, %v2350_v37  ;;  %v400_v9 = vpop.f32.mrb[3].mxu1 }
  0xe0   :  { %v589_v52 = vpack.c.bf16 %v527_v48, %v526_v45  ;;  %v556_v12 = vmax.f32 %v398_v2, 0.0  ;;  %v401_v13 = vadd.f32 %v2350_v37, %v400_v9 }
  0xe1   :  { %v588_v53 = vpack.c.bf16 %v525_v51, %v524_v50  ;;  %v1855_v54 = vpop.f32.mrb[4].mxu0  ;;  %v559_v15 = vmax.f32 %v409_v8, 0.0 }
  0xe2   :  { %v294_v56 = vadd.f32 %v1855_v54, %v2350_v37  ;;  %v285_v57 = vpop.f32.mrb[5].mxu0  ;;  %v557_v18 = vmax.f32 %v401_v13, 0.0 }
  0xe3   :  { %v286_v58 = vadd.f32 %v2350_v37, %v285_v57  ;;  %v1856_v59 = vpop.f32.mrb[6].mxu0  ;;  %1921 = vmatprep.mubr.msk.bf16.mxu1 %vm659_vm1, %v588_v53  ;;  %v2379_v21 = vpack.c.bf16 %v559_v15, %v558_v7 }
  0xe4   :  { %v297_v61 = vadd.f32 %v1856_v59, %v2350_v37  ;;  %v288_v62 = vpop.f32.mrb[7].mxu0  ;;  %1922 = vmatmul.mubr.msk.bf16.vlgmr.msra.gmra.mrb[32].mxu1 %vm659_vm1, %v589_v52  ;;  %v530_v5 = vmax.f32 %v294_v56, 0.0  ;;  %v2383_v24 = vpack.c.bf16 %v557_v18, %v556_v12  ;;  %v1887_v25 = vpop.f32.mrb[4].mxu1 }
  0xe5   :  { %v289_v1 = vadd.f32 %v2350_v37, %v288_v62  ;;  %v528_v10 = vmax.f32 %v286_v58, 0.0  ;;  %v422_v28 = vadd.f32 %v1887_v25, %v2350_v37  ;;  %v413_v29 = vpop.f32.mrb[5].mxu1 }
  0xe6   :  { %v531_v6 = vmax.f32 %v297_v61, 0.0  ;;  %v414_v31 = vadd.f32 %v2350_v37, %v413_v29  ;;  %v1888_v32 = vpop.f32.mrb[6].mxu1 }
  0xe7   :  { %v529_v11 = vmax.f32 %v289_v1, 0.0  ;;  %v562_v35 = vmax.f32 %v422_v28, 0.0  ;;  %v425_v36 = vadd.f32 %v1888_v32, %v2350_v37  ;;  %v416_v38 = vpop.f32.mrb[7].mxu1 }
  0xe8   :  { %v591_v14 = vpack.c.bf16 %v531_v6, %v530_v5  ;;  %v560_v41 = vmax.f32 %v414_v31, 0.0  ;;  %v417_v42 = vadd.f32 %v2350_v37, %v416_v38 }
  0xe9   :  { %v590_v16 = vpack.c.bf16 %v529_v11, %v528_v10  ;;  %v1859_v17 = vpop.f32.mrb[8].mxu0  ;;  %v563_v44 = vmax.f32 %v425_v36, 0.0 }
  0xea   :  { %v310_v19 = vadd.f32 %v1859_v17, %v2350_v37  ;;  %v301_v20 = vpop.f32.mrb[9].mxu0  ;;  %v561_v47 = vmax.f32 %v417_v42, 0.0 }
  0xeb   :  { %v302_v22 = vadd.f32 %v2350_v37, %v301_v20  ;;  %v1860_v23 = vpop.f32.mrb[10].mxu0  ;;  %1925 = vmatprep.mubr.msk.bf16.mxu1 %vm659_vm1, %v590_v16  ;;  %v2393_v50 = vpack.c.bf16 %v563_v44, %v562_v35 }
  0xec   :  { %v313_v26 = vadd.f32 %v1860_v23, %v2350_v37  ;;  %v304_v27 = vpop.f32.mrb[11].mxu0  ;;  %1926 = vmatmul.mubr.msk.bf16.gmra.mrb[36].mxu1 %vm659_vm1, %v591_v14  ;;  %v534_v33 = vmax.f32 %v310_v19, 0.0  ;;  %v2397_v53 = vpack.c.bf16 %v561_v47, %v560_v41  ;;  %v1891_v54 = vpop.f32.mrb[8].mxu1 }
  0xed   :  { %v305_v30 = vadd.f32 %v2350_v37, %v304_v27  ;;  %v532_v39 = vmax.f32 %v302_v22, 0.0  ;;  %v438_v57 = vadd.f32 %v1891_v54, %v2350_v37  ;;  %v429_v58 = vpop.f32.mrb[9].mxu1 }
  0xee   :  { %v535_v34 = vmax.f32 %v313_v26, 0.0  ;;  %v430_v60 = vadd.f32 %v2350_v37, %v429_v58  ;;  %v1892_v61 = vpop.f32.mrb[10].mxu1 }
  0xef   :  { %v533_v40 = vmax.f32 %v305_v30, 0.0  ;;  %v566_v0 = vmax.f32 %v438_v57, 0.0  ;;  %v441_v1 = vadd.f32 %v1892_v61, %v2350_v37  ;;  %v432_v2 = vpop.f32.mrb[11].mxu1 }
  0xf0   :  { %v593_v43 = vpack.c.bf16 %v535_v34, %v534_v33  ;;  %v564_v5 = vmax.f32 %v430_v60, 0.0  ;;  %v433_v6 = vadd.f32 %v2350_v37, %v432_v2 }
  0xf1   :  { %v592_v45 = vpack.c.bf16 %v533_v40, %v532_v39  ;;  %v1863_v46 = vpop.f32.mrb[12].mxu0  ;;  %v567_v8 = vmax.f32 %v441_v1, 0.0 }
  0xf2   :  { %v326_v48 = vadd.f32 %v1863_v46, %v2350_v37  ;;  %v317_v49 = vpop.f32.mrb[13].mxu0  ;;  %v565_v11 = vmax.f32 %v433_v6, 0.0 }
  0xf3   :  { %v318_v51 = vadd.f32 %v2350_v37, %v317_v49  ;;  %v1864_v52 = vpop.f32.mrb[14].mxu0  ;;  %1929 = vmatprep.mubr.msk.bf16.mxu1 %vm659_vm1, %v592_v45  ;;  %v2407_v14 = vpack.c.bf16 %v567_v8, %v566_v0 }
  0xf4   :  { %v329_v55 = vadd.f32 %v1864_v52, %v2350_v37  ;;  %v320_v56 = vpop.f32.mrb[15].mxu0  ;;  %1930 = vmatmul.mubr.msk.bf16.gmra.mrb[40].mxu1 %vm659_vm1, %v593_v43  ;;  %v538_v62 = vmax.f32 %v326_v48, 0.0  ;;  %v2411_v17 = vpack.c.bf16 %v565_v11, %v564_v5  ;;  %v1895_v18 = vpop.f32.mrb[12].mxu1 }
  0xf5   :  { %v321_v59 = vadd.f32 %v2350_v37, %v320_v56  ;;  %v536_v3 = vmax.f32 %v318_v51, 0.0  ;;  %v454_v22 = vadd.f32 %v1895_v18, %v2350_v37  ;;  %v445_v23 = vpop.f32.mrb[13].mxu1 }
  0xf6   :  { %v539_v63 = vmax.f32 %v329_v55, 0.0  ;;  %v446_v26 = vadd.f32 %v2350_v37, %v445_v23  ;;  %v1896_v27 = vpop.f32.mrb[14].mxu1 }
  0xf7   :  { %v537_v4 = vmax.f32 %v321_v59, 0.0  ;;  %v570_v30 = vmax.f32 %v454_v22, 0.0  ;;  %v457_v31 = vadd.f32 %v1896_v27, %v2350_v37  ;;  %v448_v32 = vpop.f32.mrb[15].mxu1 }
  0xf8   :  { %v595_v7 = vpack.c.bf16 %v539_v63, %v538_v62  ;;  %v568_v35 = vmax.f32 %v446_v26, 0.0  ;;  %v449_v36 = vadd.f32 %v2350_v37, %v448_v32 }
  0xf9   :  { %v594_v9 = vpack.c.bf16 %v537_v4, %v536_v3  ;;  %v1867_v10 = vpop.f32.mrb[16].mxu0  ;;  %v571_v39 = vmax.f32 %v457_v31, 0.0 }
  0xfa   :  { %v342_v12 = vadd.f32 %v1867_v10, %v2350_v37  ;;  %v333_v13 = vpop.f32.mrb[17].mxu0  ;;  %v569_v42 = vmax.f32 %v449_v36, 0.0 }
  0xfb   :  { %v334_v15 = vadd.f32 %v2350_v37, %v333_v13  ;;  %v1868_v16 = vpop.f32.mrb[18].mxu0  ;;  %1933 = vmatprep.mubr.msk.bf16.mxu1 %vm659_vm1, %v594_v9  ;;  %v2421_v45 = vpack.c.bf16 %v571_v39, %v570_v30 }
  0xfc   :  { %v345_v19 = vadd.f32 %v1868_v16, %v2350_v37  ;;  %v336_v20 = vpop.f32.mrb[19].mxu0  ;;  %1934 = vmatmul.mubr.msk.bf16.gmra.mrb[44].mxu1 %vm659_vm1, %v595_v7  ;;  %v542_v28 = vmax.f32 %v342_v12, 0.0  ;;  %v2425_v48 = vpack.c.bf16 %v569_v42, %v568_v35  ;;  %v1899_v49 = vpop.f32.mrb[16].mxu1 }
  0xfd   :  { %v337_v25 = vadd.f32 %v2350_v37, %v336_v20  ;;  %v540_v33 = vmax.f32 %v334_v15, 0.0  ;;  %v470_v54 = vadd.f32 %v1899_v49, %v2350_v37  ;;  %v461_v55 = vpop.f32.mrb[17].mxu1 }
  0xfe   :  { %v543_v29 = vmax.f32 %v345_v19, 0.0  ;;  %v462_v57 = vadd.f32 %v2350_v37, %v461_v55  ;;  %v1900_v58 = vpop.f32.mrb[18].mxu1 }
  0xff   :  { %v541_v34 = vmax.f32 %v337_v25, 0.0  ;;  %v574_v61 = vmax.f32 %v470_v54, 0.0  ;;  %v473_v62 = vadd.f32 %v1900_v58, %v2350_v37  ;;  %v464_v63 = vpop.f32.mrb[19].mxu1 }
 0x100   :  { %v597_v38 = vpack.c.bf16 %v543_v29, %v542_v28  ;;  %v572_v2 = vmax.f32 %v462_v57, 0.0  ;;  %v465_v3 = vadd.f32 %v2350_v37, %v464_v63 }
 0x101   :  { %v596_v40 = vpack.c.bf16 %v541_v34, %v540_v33  ;;  %v1871_v41 = vpop.f32.mrb[20].mxu0  ;;  %v575_v5 = vmax.f32 %v473_v62, 0.0 }
 0x102   :  { %v358_v43 = vadd.f32 %v1871_v41, %v2350_v37  ;;  %v349_v44 = vpop.f32.mrb[21].mxu0  ;;  %v573_v8 = vmax.f32 %v465_v3, 0.0 }
 0x103   :  { %v350_v46 = vadd.f32 %v2350_v37, %v349_v44  ;;  %v1872_v47 = vpop.f32.mrb[22].mxu0  ;;  %1937 = vmatprep.mubr.msk.bf16.mxu1 %vm659_vm1, %v596_v40  ;;  %v2435_v11 = vpack.c.bf16 %v575_v5, %v574_v61 }
 0x104   :  { %v361_v51 = vadd.f32 %v1872_v47, %v2350_v37  ;;  %v352_v52 = vpop.f32.mrb[23].mxu0  ;;  %1938 = vmatmul.mubr.msk.bf16.gmra.mrb[48].mxu1 %vm659_vm1, %v597_v38  ;;  %v546_v59 = vmax.f32 %v358_v43, 0.0  ;;  %v2439_v15 = vpack.c.bf16 %v573_v8, %v572_v2  ;;  %v1903_v16 = vpop.f32.mrb[20].mxu1 }
 0x105   :  { %v353_v56 = vadd.f32 %v2350_v37, %v352_v52  ;;  %v544_v0 = vmax.f32 %v350_v46, 0.0  ;;  %v486_v20 = vadd.f32 %v1903_v16, %v2350_v37  ;;  %v477_v22 = vpop.f32.mrb[21].mxu1 }
 0x106   :  { %v547_v60 = vmax.f32 %v361_v51, 0.0  ;;  %v478_v25 = vadd.f32 %v2350_v37, %v477_v22  ;;  %v1904_v26 = vpop.f32.mrb[22].mxu1 }
 0x107   :  { %v545_v1 = vmax.f32 %v353_v56, 0.0  ;;  %v578_v29 = vmax.f32 %v486_v20, 0.0  ;;  %v489_v30 = vadd.f32 %v1904_v26, %v2350_v37  ;;  %v480_v31 = vpop.f32.mrb[23].mxu1 }
 0x108   :  { %v599_v4 = vpack.c.bf16 %v547_v60, %v546_v59  ;;  %v576_v34 = vmax.f32 %v478_v25, 0.0  ;;  %v481_v35 = vadd.f32 %v2350_v37, %v480_v31 }
 0x109   :  { %v598_v6 = vpack.c.bf16 %v545_v1, %v544_v0  ;;  %v1875_v7 = vpop.f32.mrb[24].mxu0  ;;  %v579_v38 = vmax.f32 %v489_v30, 0.0 }
 0x10a   :  { %v374_v9 = vadd.f32 %v1875_v7, %v2350_v37  ;;  %v365_v10 = vpop.f32.mrb[25].mxu0  ;;  %v577_v41 = vmax.f32 %v481_v35, 0.0 }
 0x10b   :  { %v366_v12 = vadd.f32 %v2350_v37, %v365_v10  ;;  %v1876_v13 = vpop.f32.mrb[26].mxu0  ;;  %1941 = vmatprep.mubr.msk.bf16.mxu1 %vm659_vm1, %v598_v6  ;;  %v615_v44 = vpack.c.bf16 %v579_v38, %v578_v29 }
 0x10c   :  { %v377_v18 = vadd.f32 %v1876_v13, %v2350_v37  ;;  %v368_v19 = vpop.f32.mrb[27].mxu0  ;;  %1942 = vmatmul.mubr.msk.bf16.gmra.mrb[52].mxu1 %vm659_vm1, %v599_v4  ;;  %v550_v27 = vmax.f32 %v374_v9, 0.0  ;;  %v614_v49 = vpack.c.bf16 %v577_v41, %v576_v34  ;;  %v1907_v51 = vpop.f32.mrb[24].mxu1 }
 0x10d   :  { %v369_v23 = vadd.f32 %v2350_v37, %v368_v19  ;;  %v548_v32 = vmax.f32 %v366_v12, 0.0  ;;  %v502_v55 = vadd.f32 %v1907_v51, %v2350_v37  ;;  %v493_v56 = vpop.f32.mrb[25].mxu1 }
 0x10e   :  { %v551_v28 = vmax.f32 %v377_v18, 0.0  ;;  %v494_v58 = vadd.f32 %v2350_v37, %v493_v56  ;;  %v1908_v59 = vpop.f32.mrb[26].mxu1 }
 0x10f   :  { %v549_v33 = vmax.f32 %v369_v23, 0.0  ;;  %v582_v62 = vmax.f32 %v502_v55, 0.0  ;;  %v505_v63 = vadd.f32 %v1908_v59, %v2350_v37  ;;  %v496_v0 = vpop.f32.mrb[27].mxu1 }
 0x110   :  { %v601_v36 = vpack.c.bf16 %v551_v28, %v550_v27  ;;  %v580_v3 = vmax.f32 %v494_v58, 0.0  ;;  %v497_v4 = vadd.f32 %v2350_v37, %v496_v0 }
 0x111   :  { %v600_v39 = vpack.c.bf16 %v549_v33, %v548_v32  ;;  %v1879_v40 = vpop.f32.mrb[28].mxu0  ;;  %v583_v6 = vmax.f32 %v505_v63, 0.0 }
 0x112   :  { %v390_v42 = vadd.f32 %v1879_v40, %v2350_v37  ;;  %v381_v43 = vpop.f32.mrb[29].mxu0  ;;  %v581_v8 = vmax.f32 %v497_v4, 0.0 }
 0x113   :  { %v382_v46 = vadd.f32 %v2350_v37, %v381_v43  ;;  %v1880_v47 = vpop.f32.mrb[30].mxu0  ;;  %1945 = vmatprep.mubr.msk.bf16.mxu1 %vm659_vm1, %v600_v39  ;;  %v617_v9 = vpack.c.bf16 %v583_v6, %v582_v62 }
 0x114   :  { %v393_v52 = vadd.f32 %v1880_v47, %v2350_v37  ;;  %v384_v54 = vpop.f32.mrb[31].mxu0  ;;  %1946 = vmatmul.mubr.msk.bf16.gmra.mrb[56].mxu1 %vm659_vm1, %v601_v36  ;;  %v554_v60 = vmax.f32 %v390_v42, 0.0  ;;  %v616_v10 = vpack.c.bf16 %v581_v8, %v580_v3  ;;  %v1911_v12 = vpop.f32.mrb[28].mxu1 }
 0x115   :  { %v385_v57 = vadd.f32 %v2350_v37, %v384_v54  ;;  %v552_v1 = vmax.f32 %v382_v46, 0.0  ;;  %v518_v13 = vadd.f32 %v1911_v12, %v2350_v37  ;;  %v509_v16 = vpop.f32.mrb[29].mxu1 }
 0x116   :  { %v555_v61 = vmax.f32 %v393_v52, 0.0  ;;  %v510_v18 = vadd.f32 %v2350_v37, %v509_v16  ;;  %v1912_v19 = vpop.f32.mrb[30].mxu1 }
 0x117   :  { %v553_v2 = vmax.f32 %v385_v57, 0.0  ;;  %v586_v20 = vmax.f32 %v518_v13, 0.0  ;;  %v521_v22 = vadd.f32 %v1912_v19, %v2350_v37  ;;  %v512_v23 = vpop.f32.mrb[31].mxu1 }
 0x118   :  { %v603_v5 = vpack.c.bf16 %v555_v61, %v554_v60  ;;  %v584_v25 = vmax.f32 %v510_v18, 0.0  ;;  %v513_v26 = vadd.f32 %v2350_v37, %v512_v23  ;;  %v2493_v37 = vld [vmem:[%s2921_s4] ss:$0 sm:$0xff] }
 0x119   :  { %v602_v7 = vpack.c.bf16 %v553_v2, %v552_v1  ;;  %v587_v27 = vmax.f32 %v521_v22, 0.0 }
 0x11a   :  { %v585_v28 = vmax.f32 %v513_v26, 0.0 }
 0x11b   :  { %1949 = vmatprep.mubr.msk.bf16.mxu1 %vm659_vm1, %v602_v7  ;;  %v619_v29 = vpack.c.bf16 %v587_v27, %v586_v20 }
 0x11c   :  { %1950 = vmatmul.mubr.msk.bf16.gmra.mrb[60].mxu1 %vm659_vm1, %v603_v5  ;;  %v618_v30 = vpack.c.bf16 %v585_v28, %v584_v25 }
 0x11d   :  { %1953 = vmatprep.mubr.msk.bf16.mxu1 %vm659_vm1, %v2383_v24 }
 0x124   :  { %1954 = vmatmul.mubr.msk.bf16.gmra.mrb[64].mxu1 %vm659_vm1, %v2379_v21 }
 0x125   :  { %1957 = vmatprep.mubr.msk.bf16.mxu1 %vm659_vm1, %v2397_v53 }
 0x12c   :  { %1958 = vmatmul.mubr.msk.bf16.gmra.mrb[68].mxu1 %vm659_vm1, %v2393_v50 }
 0x12d   :  { %1961 = vmatprep.mubr.msk.bf16.mxu1 %vm659_vm1, %v2411_v17 }
 0x134   :  { %1962 = vmatmul.mubr.msk.bf16.gmra.mrb[72].mxu1 %vm659_vm1, %v2407_v14 }
 0x135   :  { %1965 = vmatprep.mubr.msk.bf16.mxu1 %vm659_vm1, %v2425_v48 }
 0x13c   :  { %1966 = vmatmul.mubr.msk.bf16.gmra.mrb[76].mxu1 %vm659_vm1, %v2421_v45 }
 0x13d   :  { %1969 = vmatprep.mubr.msk.bf16.mxu1 %vm659_vm1, %v2439_v15 }
 0x144   :  { %1970 = vmatmul.mubr.msk.bf16.gmra.mrb[80].mxu1 %vm659_vm1, %v2435_v11 }
 0x145   :  { %1973 = vmatprep.mubr.msk.bf16.mxu1 %vm659_vm1, %v614_v49 }
 0x14c   :  { %1974 = vmatmul.mubr.msk.bf16.gmra.mrb[84].mxu1 %vm659_vm1, %v615_v44 }
 0x14d   :  { %1977 = vmatprep.mubr.msk.bf16.mxu1 %vm659_vm1, %v616_v10 }
 0x154   :  { %1978 = vmatmul.mubr.msk.bf16.gmra.mrb[88].mxu1 %vm659_vm1, %v617_v9 }
 0x155   :  { %1981 = vmatprep.mubr.msk.bf16.mxu1 %vm659_vm1, %v618_v30 }
 0x15c   :  { %1982 = vmatmul.mubr.msk.bf16.gmra.mrb[92].mxu1 %vm659_vm1, %v619_v29 }
 0x1b7   :  { %v1923_v21 = vpop.f32.mrb[32].mxu1 }
 0x1b8   :  { %v799_v24 = vadd.f32 %v1923_v21, %v2493_v37  ;;  %v790_v50 = vpop.f32.mrb[33].mxu1 }
 0x1b9   :  { %v791_v53 = vadd.f32 %v2493_v37, %v790_v50  ;;  %v1924_v14 = vpop.f32.mrb[34].mxu1 }
 0x1ba   :  { %v802_v17 = vadd.f32 %v1924_v14, %v2493_v37  ;;  %v793_v45 = vpop.f32.mrb[35].mxu1  ;;  %v1047_v11 = vmax.f32 %v799_v24, 0.0 }
 0x1bb   :  { %v794_v48 = vadd.f32 %v2493_v37, %v793_v45  ;;  %v1045_v31 = vmax.f32 %v791_v53, 0.0 }
 0x1bc   :  { %v1048_v15 = vmax.f32 %v802_v17, 0.0 }
 0x1bd   :  { %v1046_v32 = vmax.f32 %v794_v48, 0.0 }
 0x1be   :  { %v1110_v33 = vpack.c.bf16 %v1048_v15, %v1047_v11 }
 0x1bf   :  { %v1109_v34 = vpack.c.bf16 %v1046_v32, %v1045_v31  ;;  %v1927_v35 = vpop.f32.mrb[36].mxu1 }
 0x1c0   :  { %v815_v36 = vadd.f32 %v1927_v35, %v2493_v37  ;;  %v806_v38 = vpop.f32.mrb[37].mxu1 }
 0x1c1   :  { %v807_v39 = vadd.f32 %v2493_v37, %v806_v38  ;;  %v1928_v40 = vpop.f32.mrb[38].mxu1  ;;  %1993 = vmatprep.mubr.msk.bf16.mxu0 %vm659_vm1, %v1109_v34 }
 0x1c2   :  { %v818_v41 = vadd.f32 %v1928_v40, %v2493_v37  ;;  %v809_v42 = vpop.f32.mrb[39].mxu1  ;;  %1994 = vmatmul.mubr.msk.bf16.vlgmr.msra.gmra.mrb[32].mxu0 %vm659_vm1, %v1110_v33  ;;  %v1051_v44 = vmax.f32 %v815_v36, 0.0 }
 0x1c3   :  { %v810_v43 = vadd.f32 %v2493_v37, %v809_v42  ;;  %v1049_v47 = vmax.f32 %v807_v39, 0.0 }
 0x1c4   :  { %v1052_v46 = vmax.f32 %v818_v41, 0.0 }
 0x1c5   :  { %v1050_v49 = vmax.f32 %v810_v43, 0.0 }
 0x1c6   :  { %v1112_v51 = vpack.c.bf16 %v1052_v46, %v1051_v44 }
 0x1c7   :  { %v1111_v52 = vpack.c.bf16 %v1050_v49, %v1049_v47  ;;  %v1931_v54 = vpop.f32.mrb[40].mxu1 }
 0x1c8   :  { %v831_v55 = vadd.f32 %v1931_v54, %v2493_v37  ;;  %v822_v56 = vpop.f32.mrb[41].mxu1 }
 0x1c9   :  { %v823_v57 = vadd.f32 %v2493_v37, %v822_v56  ;;  %v1932_v58 = vpop.f32.mrb[42].mxu1  ;;  %1997 = vmatprep.mubr.msk.bf16.mxu0 %vm659_vm1, %v1111_v52 }
 0x1ca   :  { %v834_v59 = vadd.f32 %v1932_v58, %v2493_v37  ;;  %v825_v60 = vpop.f32.mrb[43].mxu1  ;;  %1998 = vmatmul.mubr.msk.bf16.gmra.mrb[36].mxu0 %vm659_vm1, %v1112_v51  ;;  %v1055_v62 = vmax.f32 %v831_v55, 0.0 }
 0x1cb   :  { %v826_v61 = vadd.f32 %v2493_v37, %v825_v60  ;;  %v1053_v0 = vmax.f32 %v823_v57, 0.0 }
 0x1cc   :  { %v1056_v63 = vmax.f32 %v834_v59, 0.0 }
 0x1cd   :  { %v1054_v1 = vmax.f32 %v826_v61, 0.0 }
 0x1ce   :  { %v1114_v2 = vpack.c.bf16 %v1056_v63, %v1055_v62 }
 0x1cf   :  { %v1113_v3 = vpack.c.bf16 %v1054_v1, %v1053_v0  ;;  %v1935_v4 = vpop.f32.mrb[44].mxu1 }
 0x1d0   :  { %v847_v5 = vadd.f32 %v1935_v4, %v2493_v37  ;;  %v838_v6 = vpop.f32.mrb[45].mxu1 }
 0x1d1   :  { %v839_v7 = vadd.f32 %v2493_v37, %v838_v6  ;;  %v1936_v8 = vpop.f32.mrb[46].mxu1  ;;  %2001 = vmatprep.mubr.msk.bf16.mxu0 %vm659_vm1, %v1113_v3 }
 0x1d2   :  { %v850_v9 = vadd.f32 %v1936_v8, %v2493_v37  ;;  %v841_v10 = vpop.f32.mrb[47].mxu1  ;;  %2002 = vmatmul.mubr.msk.bf16.gmra.mrb[40].mxu0 %vm659_vm1, %v1114_v2  ;;  %v1059_v13 = vmax.f32 %v847_v5, 0.0 }
 0x1d3   :  { %v842_v12 = vadd.f32 %v2493_v37, %v841_v10  ;;  %v1057_v18 = vmax.f32 %v839_v7, 0.0 }
 0x1d4   :  { %v1060_v16 = vmax.f32 %v850_v9, 0.0 }
 0x1d5   :  { %v1058_v19 = vmax.f32 %v842_v12, 0.0 }
 0x1d6   :  { %v1116_v20 = vpack.c.bf16 %v1060_v16, %v1059_v13 }
 0x1d7   :  { %v1115_v22 = vpack.c.bf16 %v1058_v19, %v1057_v18  ;;  %v1939_v23 = vpop.f32.mrb[48].mxu1 }
 0x1d8   :  { %v863_v25 = vadd.f32 %v1939_v23, %v2493_v37  ;;  %v854_v26 = vpop.f32.mrb[49].mxu1 }
 0x1d9   :  { %v855_v27 = vadd.f32 %v2493_v37, %v854_v26  ;;  %v1940_v28 = vpop.f32.mrb[50].mxu1  ;;  %2005 = vmatprep.mubr.msk.bf16.mxu0 %vm659_vm1, %v1115_v22 }
 0x1da   :  { %v866_v29 = vadd.f32 %v1940_v28, %v2493_v37  ;;  %v857_v30 = vpop.f32.mrb[51].mxu1  ;;  %2006 = vmatmul.mubr.msk.bf16.gmra.mrb[44].mxu0 %vm659_vm1, %v1116_v20  ;;  %v1063_v24 = vmax.f32 %v863_v25, 0.0 }
 0x1db   :  { %v858_v21 = vadd.f32 %v2493_v37, %v857_v30  ;;  %v1061_v53 = vmax.f32 %v855_v27, 0.0 }
 0x1dc   :  { %v1064_v50 = vmax.f32 %v866_v29, 0.0 }
 0x1dd   :  { %v1062_v14 = vmax.f32 %v858_v21, 0.0 }
 0x1de   :  { %v1118_v17 = vpack.c.bf16 %v1064_v50, %v1063_v24 }
 0x1df   :  { %v1117_v45 = vpack.c.bf16 %v1062_v14, %v1061_v53  ;;  %v1943_v48 = vpop.f32.mrb[52].mxu1 }
 0x1e0   :  { %v879_v11 = vadd.f32 %v1943_v48, %v2493_v37  ;;  %v870_v15 = vpop.f32.mrb[53].mxu1 }
 0x1e1   :  { %v871_v31 = vadd.f32 %v2493_v37, %v870_v15  ;;  %v1944_v32 = vpop.f32.mrb[54].mxu1  ;;  %2009 = vmatprep.mubr.msk.bf16.mxu0 %vm659_vm1, %v1117_v45 }
 0x1e2   :  { %v882_v33 = vadd.f32 %v1944_v32, %v2493_v37  ;;  %v873_v34 = vpop.f32.mrb[55].mxu1  ;;  %2010 = vmatmul.mubr.msk.bf16.gmra.mrb[48].mxu0 %vm659_vm1, %v1118_v17  ;;  %v1067_v36 = vmax.f32 %v879_v11, 0.0 }
 0x1e3   :  { %v874_v35 = vadd.f32 %v2493_v37, %v873_v34  ;;  %v1065_v39 = vmax.f32 %v871_v31, 0.0 }
 0x1e4   :  { %v1068_v38 = vmax.f32 %v882_v33, 0.0 }
 0x1e5   :  { %v1066_v40 = vmax.f32 %v874_v35, 0.0 }
 0x1e6   :  { %v1120_v41 = vpack.c.bf16 %v1068_v38, %v1067_v36 }
 0x1e7   :  { %v1119_v42 = vpack.c.bf16 %v1066_v40, %v1065_v39  ;;  %v1947_v43 = vpop.f32.mrb[56].mxu1 }
 0x1e8   :  { %v895_v44 = vadd.f32 %v1947_v43, %v2493_v37  ;;  %v886_v46 = vpop.f32.mrb[57].mxu1 }
 0x1e9   :  { %v887_v47 = vadd.f32 %v2493_v37, %v886_v46  ;;  %v1948_v49 = vpop.f32.mrb[58].mxu1  ;;  %2013 = vmatprep.mubr.msk.bf16.mxu0 %vm659_vm1, %v1119_v42 }
 0x1ea   :  { %v898_v51 = vadd.f32 %v1948_v49, %v2493_v37  ;;  %v889_v52 = vpop.f32.mrb[59].mxu1  ;;  %2014 = vmatmul.mubr.msk.bf16.gmra.mrb[52].mxu0 %vm659_vm1, %v1120_v41  ;;  %v1071_v55 = vmax.f32 %v895_v44, 0.0 }
 0x1eb   :  { %v890_v54 = vadd.f32 %v2493_v37, %v889_v52  ;;  %v1069_v57 = vmax.f32 %v887_v47, 0.0 }
 0x1ec   :  { %v1072_v56 = vmax.f32 %v898_v51, 0.0 }
 0x1ed   :  { %v1070_v58 = vmax.f32 %v890_v54, 0.0 }
 0x1ee   :  { %v1122_v59 = vpack.c.bf16 %v1072_v56, %v1071_v55 }
 0x1ef   :  { %v1121_v60 = vpack.c.bf16 %v1070_v58, %v1069_v57  ;;  %v1951_v61 = vpop.f32.mrb[60].mxu1 }
 0x1f0   :  { %v911_v62 = vadd.f32 %v1951_v61, %v2493_v37  ;;  %v902_v63 = vpop.f32.mrb[61].mxu1 }
 0x1f1   :  { %v903_v0 = vadd.f32 %v2493_v37, %v902_v63  ;;  %v1952_v1 = vpop.f32.mrb[62].mxu1  ;;  %2017 = vmatprep.mubr.msk.bf16.mxu0 %vm659_vm1, %v1121_v60 }
 0x1f2   :  { %v914_v2 = vadd.f32 %v1952_v1, %v2493_v37  ;;  %v905_v3 = vpop.f32.mrb[63].mxu1  ;;  %2018 = vmatmul.mubr.msk.bf16.gmra.mrb[56].mxu0 %vm659_vm1, %v1122_v59  ;;  %v1075_v5 = vmax.f32 %v911_v62, 0.0 }
 0x1f3   :  { %v906_v4 = vadd.f32 %v2493_v37, %v905_v3  ;;  %v1073_v7 = vmax.f32 %v903_v0, 0.0 }
 0x1f4   :  { %v1076_v6 = vmax.f32 %v914_v2, 0.0 }
 0x1f5   :  { %v1074_v8 = vmax.f32 %v906_v4, 0.0 }
 0x1f6   :  { %v1124_v9 = vpack.c.bf16 %v1076_v6, %v1075_v5 }
 0x1f7   :  { %v1123_v10 = vpack.c.bf16 %v1074_v8, %v1073_v7  ;;  %v1955_v12 = vpop.f32.mrb[64].mxu1 }
 0x1f8   :  { %v927_v13 = vadd.f32 %v1955_v12, %v2493_v37  ;;  %v918_v16 = vpop.f32.mrb[65].mxu1 }
 0x1f9   :  { %v919_v18 = vadd.f32 %v2493_v37, %v918_v16  ;;  %v1956_v19 = vpop.f32.mrb[66].mxu1  ;;  %2021 = vmatprep.mubr.msk.bf16.mxu0 %vm659_vm1, %v1123_v10 }
 0x1fa   :  { %v930_v20 = vadd.f32 %v1956_v19, %v2493_v37  ;;  %v921_v22 = vpop.f32.mrb[67].mxu1  ;;  %2022 = vmatmul.mubr.msk.bf16.gmra.mrb[60].mxu0 %vm659_vm1, %v1124_v9  ;;  %v1079_v25 = vmax.f32 %v927_v13, 0.0 }
 0x1fb   :  { %v922_v23 = vadd.f32 %v2493_v37, %v921_v22  ;;  %v1077_v27 = vmax.f32 %v919_v18, 0.0 }
 0x1fc   :  { %v1080_v26 = vmax.f32 %v930_v20, 0.0 }
 0x1fd   :  { %v1078_v28 = vmax.f32 %v922_v23, 0.0 }
 0x1fe   :  { %v1126_v29 = vpack.c.bf16 %v1080_v26, %v1079_v25 }
 0x1ff   :  { %v1125_v30 = vpack.c.bf16 %v1078_v28, %v1077_v27  ;;  %v1959_v21 = vpop.f32.mrb[68].mxu1 }
 0x200   :  { %v943_v24 = vadd.f32 %v1959_v21, %v2493_v37  ;;  %v934_v50 = vpop.f32.mrb[69].mxu1 }
 0x201   :  { %v935_v53 = vadd.f32 %v2493_v37, %v934_v50  ;;  %v1960_v14 = vpop.f32.mrb[70].mxu1  ;;  %2025 = vmatprep.mubr.msk.bf16.mxu0 %vm659_vm1, %v1125_v30 }
 0x202   :  { %v946_v17 = vadd.f32 %v1960_v14, %v2493_v37  ;;  %v937_v45 = vpop.f32.mrb[71].mxu1  ;;  %2026 = vmatmul.mubr.msk.bf16.gmra.mrb[64].mxu0 %vm659_vm1, %v1126_v29  ;;  %v1083_v11 = vmax.f32 %v943_v24, 0.0 }
 0x203   :  { %v938_v48 = vadd.f32 %v2493_v37, %v937_v45  ;;  %v1081_v31 = vmax.f32 %v935_v53, 0.0 }
 0x204   :  { %v1084_v15 = vmax.f32 %v946_v17, 0.0 }
 0x205   :  { %v1082_v32 = vmax.f32 %v938_v48, 0.0 }
 0x206   :  { %v1128_v33 = vpack.c.bf16 %v1084_v15, %v1083_v11 }
 0x207   :  { %v1127_v34 = vpack.c.bf16 %v1082_v32, %v1081_v31  ;;  %v1963_v35 = vpop.f32.mrb[72].mxu1 }
 0x208   :  { %v959_v36 = vadd.f32 %v1963_v35, %v2493_v37  ;;  %v950_v38 = vpop.f32.mrb[73].mxu1 }
 0x209   :  { %v951_v39 = vadd.f32 %v2493_v37, %v950_v38  ;;  %v1964_v40 = vpop.f32.mrb[74].mxu1  ;;  %2029 = vmatprep.mubr.msk.bf16.mxu0 %vm659_vm1, %v1127_v34 }
 0x20a   :  { %v962_v41 = vadd.f32 %v1964_v40, %v2493_v37  ;;  %v953_v42 = vpop.f32.mrb[75].mxu1  ;;  %2030 = vmatmul.mubr.msk.bf16.gmra.mrb[68].mxu0 %vm659_vm1, %v1128_v33  ;;  %v1087_v44 = vmax.f32 %v959_v36, 0.0 }
 0x20b   :  { %v954_v43 = vadd.f32 %v2493_v37, %v953_v42  ;;  %v1085_v47 = vmax.f32 %v951_v39, 0.0 }
 0x20c   :  { %v1088_v46 = vmax.f32 %v962_v41, 0.0 }
 0x20d   :  { %v1086_v49 = vmax.f32 %v954_v43, 0.0 }
 0x20e   :  { %v1130_v51 = vpack.c.bf16 %v1088_v46, %v1087_v44 }
 0x20f   :  { %v1129_v52 = vpack.c.bf16 %v1086_v49, %v1085_v47  ;;  %v1967_v54 = vpop.f32.mrb[76].mxu1 }
 0x210   :  { %v975_v55 = vadd.f32 %v1967_v54, %v2493_v37  ;;  %v966_v56 = vpop.f32.mrb[77].mxu1 }
 0x211   :  { %v967_v57 = vadd.f32 %v2493_v37, %v966_v56  ;;  %v1968_v58 = vpop.f32.mrb[78].mxu1  ;;  %2033 = vmatprep.mubr.msk.bf16.mxu0 %vm659_vm1, %v1129_v52 }
 0x212   :  { %v978_v59 = vadd.f32 %v1968_v58, %v2493_v37  ;;  %v969_v60 = vpop.f32.mrb[79].mxu1  ;;  %2034 = vmatmul.mubr.msk.bf16.gmra.mrb[72].mxu0 %vm659_vm1, %v1130_v51  ;;  %v1091_v62 = vmax.f32 %v975_v55, 0.0 }
 0x213   :  { %v970_v61 = vadd.f32 %v2493_v37, %v969_v60  ;;  %v1089_v0 = vmax.f32 %v967_v57, 0.0 }
 0x214   :  { %v1092_v63 = vmax.f32 %v978_v59, 0.0 }
 0x215   :  { %v1090_v1 = vmax.f32 %v970_v61, 0.0  ;;  %v2594_v61 = vld [vmem:[%s2922_s6] ss:$0 sm:$0xff] }
 0x216   :  { %v1132_v2 = vpack.c.bf16 %v1092_v63, %v1091_v62 }
 0x217   :  { %v1131_v3 = vpack.c.bf16 %v1090_v1, %v1089_v0  ;;  %v1971_v4 = vpop.f32.mrb[80].mxu1 }
 0x218   :  { %v991_v5 = vadd.f32 %v1971_v4, %v2493_v37  ;;  %v982_v6 = vpop.f32.mrb[81].mxu1 }
 0x219   :  { %v983_v7 = vadd.f32 %v2493_v37, %v982_v6  ;;  %v1972_v8 = vpop.f32.mrb[82].mxu1  ;;  %2037 = vmatprep.mubr.msk.bf16.mxu0 %vm659_vm1, %v1131_v3 }
 0x21a   :  { %v994_v9 = vadd.f32 %v1972_v8, %v2493_v37  ;;  %v985_v10 = vpop.f32.mrb[83].mxu1  ;;  %2038 = vmatmul.mubr.msk.bf16.gmra.mrb[76].mxu0 %vm659_vm1, %v1132_v2  ;;  %v1095_v13 = vmax.f32 %v991_v5, 0.0 }
 0x21b   :  { %v986_v12 = vadd.f32 %v2493_v37, %v985_v10  ;;  %v1093_v18 = vmax.f32 %v983_v7, 0.0 }
 0x21c   :  { %v1096_v16 = vmax.f32 %v994_v9, 0.0 }
 0x21d   :  { %v1094_v19 = vmax.f32 %v986_v12, 0.0 }
 0x21e   :  { %v1134_v20 = vpack.c.bf16 %v1096_v16, %v1095_v13 }
 0x21f   :  { %v1133_v22 = vpack.c.bf16 %v1094_v19, %v1093_v18  ;;  %v1975_v23 = vpop.f32.mrb[84].mxu1 }
 0x220   :  { %v1007_v25 = vadd.f32 %v1975_v23, %v2493_v37  ;;  %v998_v26 = vpop.f32.mrb[85].mxu1 }
 0x221   :  { %v999_v27 = vadd.f32 %v2493_v37, %v998_v26  ;;  %v1976_v28 = vpop.f32.mrb[86].mxu1  ;;  %2041 = vmatprep.mubr.msk.bf16.mxu0 %vm659_vm1, %v1133_v22 }
 0x222   :  { %v1010_v29 = vadd.f32 %v1976_v28, %v2493_v37  ;;  %v1001_v30 = vpop.f32.mrb[87].mxu1  ;;  %2042 = vmatmul.mubr.msk.bf16.gmra.mrb[80].mxu0 %vm659_vm1, %v1134_v20  ;;  %v1099_v24 = vmax.f32 %v1007_v25, 0.0 }
 0x223   :  { %v1002_v21 = vadd.f32 %v2493_v37, %v1001_v30  ;;  %v1097_v53 = vmax.f32 %v999_v27, 0.0 }
 0x224   :  { %v1100_v50 = vmax.f32 %v1010_v29, 0.0 }
 0x225   :  { %v1098_v14 = vmax.f32 %v1002_v21, 0.0 }
 0x226   :  { %v1136_v17 = vpack.c.bf16 %v1100_v50, %v1099_v24 }
 0x227   :  { %v1135_v45 = vpack.c.bf16 %v1098_v14, %v1097_v53  ;;  %v1979_v48 = vpop.f32.mrb[88].mxu1 }
 0x228   :  { %v1023_v11 = vadd.f32 %v1979_v48, %v2493_v37  ;;  %v1014_v15 = vpop.f32.mrb[89].mxu1 }
 0x229   :  { %v1015_v31 = vadd.f32 %v2493_v37, %v1014_v15  ;;  %v1980_v32 = vpop.f32.mrb[90].mxu1  ;;  %2045 = vmatprep.mubr.msk.bf16.mxu0 %vm659_vm1, %v1135_v45 }
 0x22a   :  { %v1026_v33 = vadd.f32 %v1980_v32, %v2493_v37  ;;  %v1017_v34 = vpop.f32.mrb[91].mxu1  ;;  %2046 = vmatmul.mubr.msk.bf16.gmra.mrb[84].mxu0 %vm659_vm1, %v1136_v17  ;;  %v1103_v36 = vmax.f32 %v1023_v11, 0.0 }
 0x22b   :  { %v1018_v35 = vadd.f32 %v2493_v37, %v1017_v34  ;;  %v1101_v39 = vmax.f32 %v1015_v31, 0.0 }
 0x22c   :  { %v1104_v38 = vmax.f32 %v1026_v33, 0.0 }
 0x22d   :  { %v1102_v40 = vmax.f32 %v1018_v35, 0.0 }
 0x22e   :  { %v1138_v41 = vpack.c.bf16 %v1104_v38, %v1103_v36 }
 0x22f   :  { %v1137_v42 = vpack.c.bf16 %v1102_v40, %v1101_v39  ;;  %v1983_v43 = vpop.f32.mrb[92].mxu1 }
 0x230   :  { %v1039_v44 = vadd.f32 %v1983_v43, %v2493_v37  ;;  %v1030_v46 = vpop.f32.mrb[93].mxu1 }
 0x231   :  { %v1031_v47 = vadd.f32 %v2493_v37, %v1030_v46  ;;  %v1984_v49 = vpop.f32.mrb[94].mxu1  ;;  %2049 = vmatprep.mubr.msk.bf16.mxu0 %vm659_vm1, %v1137_v42 }
 0x232   :  { %v1042_v51 = vadd.f32 %v1984_v49, %v2493_v37  ;;  %v1033_v52 = vpop.f32.mrb[95].mxu1  ;;  %2050 = vmatmul.mubr.msk.bf16.gmra.mrb[88].mxu0 %vm659_vm1, %v1138_v41  ;;  %v1107_v55 = vmax.f32 %v1039_v44, 0.0 }
 0x233   :  { %v1034_v54 = vadd.f32 %v2493_v37, %v1033_v52  ;;  %v1105_v57 = vmax.f32 %v1031_v47, 0.0 }
 0x234   :  { %v1108_v56 = vmax.f32 %v1042_v51, 0.0 }
 0x235   :  { %v1106_v58 = vmax.f32 %v1034_v54, 0.0 }
 0x236   :  { %v1140_v59 = vpack.c.bf16 %v1108_v56, %v1107_v55 }
 0x237   :  { %v1139_v60 = vpack.c.bf16 %v1106_v58, %v1105_v57 }
 0x239   :  { %2053 = vmatprep.mubr.msk.bf16.mxu0 %vm659_vm1, %v1139_v60 }
 0x23a   :  { %2054 = vmatmul.mubr.msk.bf16.gmra.mrb[92].mxu0 %vm659_vm1, %v1140_v59 }
 0x295   :  { %v1995_v62 = vpop.f32.mrb[32].mxu0 }
 0x296   :  { %v1319_v63 = vadd.f32 %v1995_v62, %v2594_v61  ;;  %v1310_v37 = vpop.f32.mrb[33].mxu0 }
 0x297   :  { %v1311_v0 = vadd.f32 %v2594_v61, %v1310_v37  ;;  %v1996_v1 = vpop.f32.mrb[34].mxu0 }
 0x298   :  { %1568 = vst.msk [vmem:[%s2923_s7 + $0x10] sm:$0xff] %vm1565_vm2, %v1319_v63  ;;  %v1322_v2 = vadd.f32 %v1996_v1, %v2594_v61  ;;  %v1313_v3 = vpop.f32.mrb[35].mxu0 }
 0x299   :  { %1566 = vst.msk [vmem:[%s2923_s7] sm:$0xff] %vm1565_vm2, %v1311_v0  ;;  %v1314_v4 = vadd.f32 %v2594_v61, %v1313_v3 }
 0x29a   :  { %1569 = vst.msk [vmem:[%s2923_s7 + $0x18] sm:$0xff] %vm1565_vm2, %v1322_v2 }
 0x29b   :  { %1567 = vst.msk [vmem:[%s2923_s7 + $0x8] sm:$0xff] %vm1565_vm2, %v1314_v4 }
 0x29d   :  { %v1999_v5 = vpop.f32.mrb[36].mxu0 }
 0x29e   :  { %v1335_v6 = vadd.f32 %v1999_v5, %v2594_v61  ;;  %v1326_v7 = vpop.f32.mrb[37].mxu0 }
 0x29f   :  { %v1327_v8 = vadd.f32 %v2594_v61, %v1326_v7  ;;  %v2000_v9 = vpop.f32.mrb[38].mxu0 }
 0x2a0   :  { %1572 = vst.msk [vmem:[%s2923_s7 + $0x30] sm:$0xff] %vm1565_vm2, %v1335_v6  ;;  %v1338_v10 = vadd.f32 %v2000_v9, %v2594_v61  ;;  %v1329_v12 = vpop.f32.mrb[39].mxu0 }
 0x2a1   :  { %1570 = vst.msk [vmem:[%s2923_s7 + $0x20] sm:$0xff] %vm1565_vm2, %v1327_v8  ;;  %v1330_v13 = vadd.f32 %v2594_v61, %v1329_v12 }
 0x2a2   :  { %1573 = vst.msk [vmem:[%s2923_s7 + $0x38] sm:$0xff] %vm1565_vm2, %v1338_v10 }
 0x2a3   :  { %1571 = vst.msk [vmem:[%s2923_s7 + $0x28] sm:$0xff] %vm1565_vm2, %v1330_v13 }
 0x2a5   :  { %v2003_v16 = vpop.f32.mrb[40].mxu0 }
 0x2a6   :  { %v1351_v18 = vadd.f32 %v2003_v16, %v2594_v61  ;;  %v1342_v19 = vpop.f32.mrb[41].mxu0 }
 0x2a7   :  { %v1343_v20 = vadd.f32 %v2594_v61, %v1342_v19  ;;  %v2004_v22 = vpop.f32.mrb[42].mxu0 }
 0x2a8   :  { %1576 = vst.msk [vmem:[%s2923_s7 + $0x50] sm:$0xff] %vm1565_vm2, %v1351_v18  ;;  %v1354_v23 = vadd.f32 %v2004_v22, %v2594_v61  ;;  %v1345_v25 = vpop.f32.mrb[43].mxu0 }
 0x2a9   :  { %1574 = vst.msk [vmem:[%s2923_s7 + $0x40] sm:$0xff] %vm1565_vm2, %v1343_v20  ;;  %v1346_v26 = vadd.f32 %v2594_v61, %v1345_v25 }
 0x2aa   :  { %1577 = vst.msk [vmem:[%s2923_s7 + $0x58] sm:$0xff] %vm1565_vm2, %v1354_v23 }
 0x2ab   :  { %1575 = vst.msk [vmem:[%s2923_s7 + $0x48] sm:$0xff] %vm1565_vm2, %v1346_v26 }
 0x2ad   :  { %v2007_v27 = vpop.f32.mrb[44].mxu0 }
 0x2ae   :  { %v1367_v28 = vadd.f32 %v2007_v27, %v2594_v61  ;;  %v1358_v29 = vpop.f32.mrb[45].mxu0 }
 0x2af   :  { %v1359_v30 = vadd.f32 %v2594_v61, %v1358_v29  ;;  %v2008_v21 = vpop.f32.mrb[46].mxu0 }
 0x2b0   :  { %1580 = vst.msk [vmem:[%s2923_s7 + $0x70] sm:$0xff] %vm1565_vm2, %v1367_v28  ;;  %v1370_v24 = vadd.f32 %v2008_v21, %v2594_v61  ;;  %v1361_v50 = vpop.f32.mrb[47].mxu0 }
 0x2b1   :  { %1578 = vst.msk [vmem:[%s2923_s7 + $0x60] sm:$0xff] %vm1565_vm2, %v1359_v30  ;;  %v1362_v53 = vadd.f32 %v2594_v61, %v1361_v50 }
 0x2b2   :  { %1581 = vst.msk [vmem:[%s2923_s7 + $0x78] sm:$0xff] %vm1565_vm2, %v1370_v24 }
 0x2b3   :  { %1579 = vst.msk [vmem:[%s2923_s7 + $0x68] sm:$0xff] %vm1565_vm2, %v1362_v53 }
 0x2b5   :  { %v2011_v14 = vpop.f32.mrb[48].mxu0 }
 0x2b6   :  { %v1383_v17 = vadd.f32 %v2011_v14, %v2594_v61  ;;  %v1374_v45 = vpop.f32.mrb[49].mxu0 }
 0x2b7   :  { %v1375_v48 = vadd.f32 %v2594_v61, %v1374_v45  ;;  %v2012_v11 = vpop.f32.mrb[50].mxu0 }
 0x2b8   :  { %1584 = vst.msk [vmem:[%s2923_s7 + $0x90] sm:$0xff] %vm1565_vm2, %v1383_v17  ;;  %v1386_v15 = vadd.f32 %v2012_v11, %v2594_v61  ;;  %v1377_v31 = vpop.f32.mrb[51].mxu0 }
 0x2b9   :  { %1582 = vst.msk [vmem:[%s2923_s7 + $0x80] sm:$0xff] %vm1565_vm2, %v1375_v48  ;;  %v1378_v32 = vadd.f32 %v2594_v61, %v1377_v31 }
 0x2ba   :  { %1585 = vst.msk [vmem:[%s2923_s7 + $0x98] sm:$0xff] %vm1565_vm2, %v1386_v15 }
 0x2bb   :  { %1583 = vst.msk [vmem:[%s2923_s7 + $0x88] sm:$0xff] %vm1565_vm2, %v1378_v32 }
 0x2bd   :  { %v2015_v33 = vpop.f32.mrb[52].mxu0 }
 0x2be   :  { %v1399_v34 = vadd.f32 %v2015_v33, %v2594_v61  ;;  %v1390_v35 = vpop.f32.mrb[53].mxu0 }
 0x2bf   :  { %v1391_v36 = vadd.f32 %v2594_v61, %v1390_v35  ;;  %v2016_v38 = vpop.f32.mrb[54].mxu0 }
 0x2c0   :  { %1588 = vst.msk [vmem:[%s2923_s7 + $0xb0] sm:$0xff] %vm1565_vm2, %v1399_v34  ;;  %v1402_v39 = vadd.f32 %v2016_v38, %v2594_v61  ;;  %v1393_v40 = vpop.f32.mrb[55].mxu0 }
 0x2c1   :  { %1586 = vst.msk [vmem:[%s2923_s7 + $0xa0] sm:$0xff] %vm1565_vm2, %v1391_v36  ;;  %v1394_v41 = vadd.f32 %v2594_v61, %v1393_v40 }
 0x2c2   :  { %1589 = vst.msk [vmem:[%s2923_s7 + $0xb8] sm:$0xff] %vm1565_vm2, %v1402_v39 }
 0x2c3   :  { %1587 = vst.msk [vmem:[%s2923_s7 + $0xa8] sm:$0xff] %vm1565_vm2, %v1394_v41 }
 0x2c5   :  { %v2019_v42 = vpop.f32.mrb[56].mxu0 }
 0x2c6   :  { %v1415_v43 = vadd.f32 %v2019_v42, %v2594_v61  ;;  %v1406_v44 = vpop.f32.mrb[57].mxu0 }
 0x2c7   :  { %v1407_v46 = vadd.f32 %v2594_v61, %v1406_v44  ;;  %v2020_v47 = vpop.f32.mrb[58].mxu0 }
 0x2c8   :  { %1592 = vst.msk [vmem:[%s2923_s7 + $0xd0] sm:$0xff] %vm1565_vm2, %v1415_v43  ;;  %v1418_v49 = vadd.f32 %v2020_v47, %v2594_v61  ;;  %v1409_v51 = vpop.f32.mrb[59].mxu0 }
 0x2c9   :  { %1590 = vst.msk [vmem:[%s2923_s7 + $0xc0] sm:$0xff] %vm1565_vm2, %v1407_v46  ;;  %v1410_v52 = vadd.f32 %v2594_v61, %v1409_v51 }
 0x2ca   :  { %1593 = vst.msk [vmem:[%s2923_s7 + $0xd8] sm:$0xff] %vm1565_vm2, %v1418_v49 }
 0x2cb   :  { %1591 = vst.msk [vmem:[%s2923_s7 + $0xc8] sm:$0xff] %vm1565_vm2, %v1410_v52 }
 0x2cd   :  { %v2023_v54 = vpop.f32.mrb[60].mxu0 }
 0x2ce   :  { %v1431_v55 = vadd.f32 %v2023_v54, %v2594_v61  ;;  %v1422_v56 = vpop.f32.mrb[61].mxu0 }
 0x2cf   :  { %v1423_v57 = vadd.f32 %v2594_v61, %v1422_v56  ;;  %v2024_v58 = vpop.f32.mrb[62].mxu0 }
 0x2d0   :  { %1596 = vst.msk [vmem:[%s2923_s7 + $0xf0] sm:$0xff] %vm1565_vm2, %v1431_v55  ;;  %v1434_v59 = vadd.f32 %v2024_v58, %v2594_v61  ;;  %v1425_v60 = vpop.f32.mrb[63].mxu0 }
 0x2d1   :  { %1594 = vst.msk [vmem:[%s2923_s7 + $0xe0] sm:$0xff] %vm1565_vm2, %v1423_v57  ;;  %v1426_v62 = vadd.f32 %v2594_v61, %v1425_v60 }
 0x2d2   :  { %1597 = vst.msk [vmem:[%s2923_s7 + $0xf8] sm:$0xff] %vm1565_vm2, %v1434_v59 }
 0x2d3   :  { %1595 = vst.msk [vmem:[%s2923_s7 + $0xe8] sm:$0xff] %vm1565_vm2, %v1426_v62 }
 0x2d5   :  { %v2027_v63 = vpop.f32.mrb[64].mxu0 }
 0x2d6   :  { %v1447_v37 = vadd.f32 %v2027_v63, %v2594_v61  ;;  %v1438_v0 = vpop.f32.mrb[65].mxu0 }
 0x2d7   :  { %v1439_v1 = vadd.f32 %v2594_v61, %v1438_v0  ;;  %v2028_v2 = vpop.f32.mrb[66].mxu0 }
 0x2d8   :  { %1600 = vst.msk [vmem:[%s2923_s7 + $0x110] sm:$0xff] %vm1565_vm2, %v1447_v37  ;;  %v1450_v3 = vadd.f32 %v2028_v2, %v2594_v61  ;;  %v1441_v4 = vpop.f32.mrb[67].mxu0 }
 0x2d9   :  { %1598 = vst.msk [vmem:[%s2923_s7 + $0x100] sm:$0xff] %vm1565_vm2, %v1439_v1  ;;  %v1442_v5 = vadd.f32 %v2594_v61, %v1441_v4 }
 0x2da   :  { %1601 = vst.msk [vmem:[%s2923_s7 + $0x118] sm:$0xff] %vm1565_vm2, %v1450_v3 }
 0x2db   :  { %1599 = vst.msk [vmem:[%s2923_s7 + $0x108] sm:$0xff] %vm1565_vm2, %v1442_v5 }
 0x2dd   :  { %v2031_v6 = vpop.f32.mrb[68].mxu0 }
 0x2de   :  { %v1463_v7 = vadd.f32 %v2031_v6, %v2594_v61  ;;  %v1454_v8 = vpop.f32.mrb[69].mxu0 }
 0x2df   :  { %v1455_v9 = vadd.f32 %v2594_v61, %v1454_v8  ;;  %v2032_v10 = vpop.f32.mrb[70].mxu0 }
 0x2e0   :  { %1604 = vst.msk [vmem:[%s2923_s7 + $0x130] sm:$0xff] %vm1565_vm2, %v1463_v7  ;;  %v1466_v12 = vadd.f32 %v2032_v10, %v2594_v61  ;;  %v1457_v13 = vpop.f32.mrb[71].mxu0 }
 0x2e1   :  { %1602 = vst.msk [vmem:[%s2923_s7 + $0x120] sm:$0xff] %vm1565_vm2, %v1455_v9  ;;  %v1458_v16 = vadd.f32 %v2594_v61, %v1457_v13 }
 0x2e2   :  { %1605 = vst.msk [vmem:[%s2923_s7 + $0x138] sm:$0xff] %vm1565_vm2, %v1466_v12 }
 0x2e3   :  { %1603 = vst.msk [vmem:[%s2923_s7 + $0x128] sm:$0xff] %vm1565_vm2, %v1458_v16 }
 0x2e5   :  { %v2035_v18 = vpop.f32.mrb[72].mxu0 }
 0x2e6   :  { %v1479_v19 = vadd.f32 %v2035_v18, %v2594_v61  ;;  %v1470_v20 = vpop.f32.mrb[73].mxu0 }
 0x2e7   :  { %v1471_v22 = vadd.f32 %v2594_v61, %v1470_v20  ;;  %v2036_v23 = vpop.f32.mrb[74].mxu0 }
 0x2e8   :  { %1608 = vst.msk [vmem:[%s2923_s7 + $0x150] sm:$0xff] %vm1565_vm2, %v1479_v19  ;;  %v1482_v25 = vadd.f32 %v2036_v23, %v2594_v61  ;;  %v1473_v26 = vpop.f32.mrb[75].mxu0 }
 0x2e9   :  { %1606 = vst.msk [vmem:[%s2923_s7 + $0x140] sm:$0xff] %vm1565_vm2, %v1471_v22  ;;  %v1474_v27 = vadd.f32 %v2594_v61, %v1473_v26 }
 0x2ea   :  { %1609 = vst.msk [vmem:[%s2923_s7 + $0x158] sm:$0xff] %vm1565_vm2, %v1482_v25 }
 0x2eb   :  { %1607 = vst.msk [vmem:[%s2923_s7 + $0x148] sm:$0xff] %vm1565_vm2, %v1474_v27 }
 0x2ed   :  { %v2039_v28 = vpop.f32.mrb[76].mxu0 }
 0x2ee   :  { %v1495_v29 = vadd.f32 %v2039_v28, %v2594_v61  ;;  %v1486_v30 = vpop.f32.mrb[77].mxu0 }
 0x2ef   :  { %v1487_v21 = vadd.f32 %v2594_v61, %v1486_v30  ;;  %v2040_v24 = vpop.f32.mrb[78].mxu0 }
 0x2f0   :  { %1612 = vst.msk [vmem:[%s2923_s7 + $0x170] sm:$0xff] %vm1565_vm2, %v1495_v29  ;;  %v1498_v50 = vadd.f32 %v2040_v24, %v2594_v61  ;;  %v1489_v53 = vpop.f32.mrb[79].mxu0 }
 0x2f1   :  { %1610 = vst.msk [vmem:[%s2923_s7 + $0x160] sm:$0xff] %vm1565_vm2, %v1487_v21  ;;  %v1490_v14 = vadd.f32 %v2594_v61, %v1489_v53 }
 0x2f2   :  { %1613 = vst.msk [vmem:[%s2923_s7 + $0x178] sm:$0xff] %vm1565_vm2, %v1498_v50 }
 0x2f3   :  { %1611 = vst.msk [vmem:[%s2923_s7 + $0x168] sm:$0xff] %vm1565_vm2, %v1490_v14 }
 0x2f5   :  { %v2043_v17 = vpop.f32.mrb[80].mxu0 }
 0x2f6   :  { %v1511_v45 = vadd.f32 %v2043_v17, %v2594_v61  ;;  %v1502_v48 = vpop.f32.mrb[81].mxu0 }
 0x2f7   :  { %v1503_v11 = vadd.f32 %v2594_v61, %v1502_v48  ;;  %v2044_v15 = vpop.f32.mrb[82].mxu0 }
 0x2f8   :  { %1616 = vst.msk [vmem:[%s2923_s7 + $0x190] sm:$0xff] %vm1565_vm2, %v1511_v45  ;;  %v1514_v31 = vadd.f32 %v2044_v15, %v2594_v61  ;;  %v1505_v32 = vpop.f32.mrb[83].mxu0 }
 0x2f9   :  { %1614 = vst.msk [vmem:[%s2923_s7 + $0x180] sm:$0xff] %vm1565_vm2, %v1503_v11  ;;  %v1506_v33 = vadd.f32 %v2594_v61, %v1505_v32 }
 0x2fa   :  { %1617 = vst.msk [vmem:[%s2923_s7 + $0x198] sm:$0xff] %vm1565_vm2, %v1514_v31 }
 0x2fb   :  { %1615 = vst.msk [vmem:[%s2923_s7 + $0x188] sm:$0xff] %vm1565_vm2, %v1506_v33 }
 0x2fd   :  { %v2047_v34 = vpop.f32.mrb[84].mxu0 }
 0x2fe   :  { %v1527_v35 = vadd.f32 %v2047_v34, %v2594_v61  ;;  %v1518_v36 = vpop.f32.mrb[85].mxu0 }
 0x2ff   :  { %v1519_v38 = vadd.f32 %v2594_v61, %v1518_v36  ;;  %v2048_v39 = vpop.f32.mrb[86].mxu0 }
 0x300   :  { %1620 = vst.msk [vmem:[%s2923_s7 + $0x1b0] sm:$0xff] %vm1565_vm2, %v1527_v35  ;;  %v1530_v40 = vadd.f32 %v2048_v39, %v2594_v61  ;;  %v1521_v41 = vpop.f32.mrb[87].mxu0 }
 0x301   :  { %1618 = vst.msk [vmem:[%s2923_s7 + $0x1a0] sm:$0xff] %vm1565_vm2, %v1519_v38  ;;  %v1522_v42 = vadd.f32 %v2594_v61, %v1521_v41 }
 0x302   :  { %1621 = vst.msk [vmem:[%s2923_s7 + $0x1b8] sm:$0xff] %vm1565_vm2, %v1530_v40 }
 0x303   :  { %1619 = vst.msk [vmem:[%s2923_s7 + $0x1a8] sm:$0xff] %vm1565_vm2, %v1522_v42 }
 0x305   :  { %v2051_v43 = vpop.f32.mrb[88].mxu0 }
 0x306   :  { %v1543_v44 = vadd.f32 %v2051_v43, %v2594_v61  ;;  %v1534_v46 = vpop.f32.mrb[89].mxu0 }
 0x307   :  { %v1535_v47 = vadd.f32 %v2594_v61, %v1534_v46  ;;  %v2052_v49 = vpop.f32.mrb[90].mxu0 }
 0x308   :  { %1624 = vst.msk [vmem:[%s2923_s7 + $0x1d0] sm:$0xff] %vm1565_vm2, %v1543_v44  ;;  %v1546_v51 = vadd.f32 %v2052_v49, %v2594_v61  ;;  %v1537_v52 = vpop.f32.mrb[91].mxu0 }
 0x309   :  { %1622 = vst.msk [vmem:[%s2923_s7 + $0x1c0] sm:$0xff] %vm1565_vm2, %v1535_v47  ;;  %v1538_v54 = vadd.f32 %v2594_v61, %v1537_v52 }
 0x30a   :  { %1625 = vst.msk [vmem:[%s2923_s7 + $0x1d8] sm:$0xff] %vm1565_vm2, %v1546_v51 }
 0x30b   :  { %1623 = vst.msk [vmem:[%s2923_s7 + $0x1c8] sm:$0xff] %vm1565_vm2, %v1538_v54 }
 0x30d   :  { %v2055_v55 = vpop.f32.mrb[92].mxu0 }
 0x30e   :  { %v1559_v56 = vadd.f32 %v2055_v55, %v2594_v61  ;;  %v1550_v57 = vpop.f32.mrb[93].mxu0 }
 0x30f   :  { %v1551_v58 = vadd.f32 %v2594_v61, %v1550_v57  ;;  %v2056_v59 = vpop.f32.mrb[94].mxu0 }
 0x310   :  { %1628 = vst.msk [vmem:[%s2923_s7 + $0x1f0] sm:$0xff] %vm1565_vm2, %v1559_v56  ;;  %v1562_v60 = vadd.f32 %v2056_v59, %v2594_v61  ;;  %v1553_v62 = vpop.f32.mrb[95].mxu0 }
 0x311   :  { %1626 = vst.msk [vmem:[%s2923_s7 + $0x1e0] sm:$0xff] %vm1565_vm2, %v1551_v58  ;;  %v1554_v63 = vadd.f32 %v2594_v61, %v1553_v62 }
 0x312   :  { %1629 = vst.msk [vmem:[%s2923_s7 + $0x1f8] sm:$0xff] %vm1565_vm2, %v1562_v60 }
 0x313   :  { %1627 = vst.msk [vmem:[%s2923_s7 + $0x1e8] sm:$0xff] %vm1565_vm2, %v1554_v63 }

</bundles_post_ra>
